<compile_context>
chip_gen: v5e
topology: v5e:2x2
jax: 0.10.0
libtpu: 0.0.40
codegen_flags: <defaults>
</compile_context>

<pallas_src>
import jax
import jax.numpy as jnp
from jax.experimental import pallas as pl
from jax.experimental.pallas import tpu as pltpu

FEAT = 128                       # lane-dense padded width for all feature dims
TM = 256                         # adj row block (multiple of 256 for v6e MXU)
TK = 512                         # adj column / reduction block
VMEM_LIMIT = 48 * 1024 * 1024    # headroom under v7x's 64 MiB physical VMEM


def _round_up(n, m):
    return ((n + m - 1) // m) * m


# ------------------------------------------------------------------ kernels --
def gcn_layer_kernel(adj_ref, x_ref, w_ref, b_ref, out_ref, acc_ref):
    """out[i] = relu(((Ahat @ X)[i]) @ W + b), tiled over (row_block, k_block)."""
    k = pl.program_id(1)

    @pl.when(k == 0)
    def _():
        acc_ref[...] = jnp.zeros_like(acc_ref)

    acc_ref[...] += jnp.dot(adj_ref[...], x_ref[...],
                            preferred_element_type=jnp.float32)

    @pl.when(k == pl.num_programs(1) - 1)
    def _():
        h = jnp.dot(acc_ref[...].astype(jnp.bfloat16), w_ref[...],
                    preferred_element_type=jnp.float32) + b_ref[...]
        out_ref[...] = jnp.maximum(h, 0.0).astype(out_ref.dtype)
        # TODO(synk): F.dropout is identity here (inference / eval-mode).


def pool_head_kernel(pool_ref, h_ref, w1_ref, b1_ref, w2_ref, b2_ref,
                     out_ref, acc_ref):
    """out = relu((pool @ h) @ Wf1 + bf1) @ Wf2 + bf2, reduced over node blocks."""
    k = pl.program_id(0)

    @pl.when(k == 0)
    def _():
        acc_ref[...] = jnp.zeros_like(acc_ref)

    acc_ref[...] += jnp.dot(pool_ref[...], h_ref[...],
                            preferred_element_type=jnp.float32)

    @pl.when(k == pl.num_programs(0) - 1)
    def _():
        g = jnp.maximum(
            jnp.dot(acc_ref[...].astype(jnp.bfloat16), w1_ref[...],
                    preferred_element_type=jnp.float32) + b1_ref[...], 0.0)
        out_ref[...] = (jnp.dot(g.astype(jnp.bfloat16), w2_ref[...],
                                preferred_element_type=jnp.float32) + b2_ref[...])


# ----------------------------------------------------------------- wrappers --
def gcn_layer(adj, x, w, b, *, tm=TM, tk=TK):
    n_pad = adj.shape[0]
    grid = (n_pad // tm, n_pad // tk)
    flops = 2 * n_pad * n_pad * FEAT + 2 * n_pad * FEAT * FEAT
    bytes_accessed = int(adj.size * 2 + x.size * 2 + w.size * 2 + b.size * 4
                         + n_pad * FEAT * 2)
    return pl.pallas_call(
        gcn_layer_kernel,
        out_shape=jax.ShapeDtypeStruct((n_pad, FEAT), jnp.bfloat16),
        grid_spec=pltpu.PrefetchScalarGridSpec(
            num_scalar_prefetch=0,
            grid=grid,
            in_specs=[
                pl.BlockSpec((tm, tk), lambda i, k: (i, k)),      # Ahat tile
                pl.BlockSpec((tk, FEAT), lambda i, k: (k, 0)),    # X panel
                pl.BlockSpec((FEAT, FEAT), lambda i, k: (0, 0)),  # W (resident)
                pl.BlockSpec((1, FEAT), lambda i, k: (0, 0)),     # bias
            ],
            out_specs=pl.BlockSpec((tm, FEAT), lambda i, k: (i, 0)),
            scratch_shapes=[pltpu.VMEM((tm, FEAT), jnp.float32)],
        ),
        compiler_params=pltpu.CompilerParams(
            dimension_semantics=("parallel", "arbitrary"),
            vmem_limit_bytes=VMEM_LIMIT),
        cost_estimate=pl.CostEstimate(flops=flops, transcendentals=0,
                                      bytes_accessed=bytes_accessed),
    )(adj, x, w, b)


def pool_head(pool, h, wf1, bf1, wf2, bf2, *, tk=TK):
    g_pad, n_pad = pool.shape
    grid = (n_pad // tk,)
    flops = 2 * g_pad * n_pad * FEAT + 4 * g_pad * FEAT * FEAT
    bytes_accessed = int(pool.size * 2 + h.size * 2 + wf1.size * 2
                         + wf2.size * 2 + bf1.size * 4 + bf2.size * 4
                         + g_pad * FEAT * 4)
    return pl.pallas_call(
        pool_head_kernel,
        out_shape=jax.ShapeDtypeStruct((g_pad, FEAT), jnp.float32),
        grid_spec=pltpu.PrefetchScalarGridSpec(
            num_scalar_prefetch=0,
            grid=grid,
            in_specs=[
                pl.BlockSpec((g_pad, tk), lambda k: (0, k)),    # pool panel
                pl.BlockSpec((tk, FEAT), lambda k: (k, 0)),     # h panel
                pl.BlockSpec((FEAT, FEAT), lambda k: (0, 0)),   # W_fc1
                pl.BlockSpec((1, FEAT), lambda k: (0, 0)),      # b_fc1
                pl.BlockSpec((FEAT, FEAT), lambda k: (0, 0)),   # W_fc2
                pl.BlockSpec((1, FEAT), lambda k: (0, 0)),      # b_fc2
            ],
            out_specs=pl.BlockSpec((g_pad, FEAT), lambda k: (0, 0)),
            scratch_shapes=[pltpu.VMEM((g_pad, FEAT), jnp.float32)],
        ),
        compiler_params=pltpu.CompilerParams(
            dimension_semantics=("arbitrary",),
            vmem_limit_bytes=VMEM_LIMIT),
        cost_estimate=pl.CostEstimate(flops=flops, transcendentals=0,
                                      bytes_accessed=bytes_accessed),
    )(pool, h, wf1, bf1, wf2, bf2)


def prebuilt_graph_nn_forward(x_pad, adj, pool, prep, num_graphs, num_classes):
    """Equivalent of PrebuiltGraphNN(model_type='gcn', num_layers=2).forward."""
    h1 = gcn_layer(adj, x_pad, prep["w1"], prep["b1"])     # conv1 (input_proj folded)
    h2 = gcn_layer(adj, h1, prep["w2"], prep["b2"])         # conv2
    out_pad = pool_head(pool, h2, prep["wf1"], prep["bf1"],
                        prep["wf2"], prep["bf2"])            # mean-pool + fc1 + fc2
    return out_pad[:num_graphs, :num_classes]


# ---------------------------------------------------- one-time host-side prep --
def build_graph_matrices(edge_index, batch, num_nodes, num_graphs, n_pad, g_pad):
    """Dense GCN-normalized Ahat and mean-pool matrix, zero-padded (hoisted)."""
    N = num_nodes
    src, dst = edge_index[0], edge_index[1]
    loop = jnp.arange(N, dtype=edge_index.dtype)
    src = jnp.concatenate([src, loop])
    dst = jnp.concatenate([dst, loop])
    # NOTE: assumes edge_index contains both directions (PyG undirected style).
    deg = jnp.zeros((N,), jnp.float32).at[dst].add(1.0)
    dinv = jnp.where(deg > 0, 1.0 / jnp.sqrt(deg), 0.0)
    norm = dinv[src] * dinv[dst]
    adj = jnp.zeros((N, N), jnp.float32).at[dst, src].add(norm)
    adj = jnp.pad(adj, ((0, n_pad - N), (0, n_pad - N)))

    counts = jnp.zeros((num_graphs,), jnp.float32).at[batch].add(1.0)
    onehot = (batch[None, :] == jnp.arange(num_graphs)[:, None]).astype(jnp.float32)
    pool = onehot / jnp.maximum(counts, 1.0)[:, None]
    pool = jnp.pad(pool, ((0, g_pad - num_graphs), (0, n_pad - N)))
    return adj.astype(jnp.bfloat16), pool.astype(jnp.bfloat16)


def prepare_params(params):
    """Fold input_proj into conv1, zero-pad every dim to 128, cast MXU weights bf16."""
    f32, bf16 = jnp.float32, jnp.bfloat16
    din, hid = params["w_in"].shape
    h2 = params["w_fc1"].shape[1]
    nc = params["w_fc2"].shape[1]
    assert din + 1 <= FEAT and hid <= FEAT and h2 <= FEAT and nc <= FEAT

    # (x @ W_in + b_in) @ W_c1  ==  x_aug @ W1  with W1[din,:] = b_in @ W_c1
    w_fold = params["w_in"].astype(f32) @ params["w_c1"].astype(f32)
    b_fold = params["b_in"].astype(f32) @ params["w_c1"].astype(f32)
    w1 = jnp.zeros((FEAT, FEAT), f32).at[:din, :hid].set(w_fold)
    w1 = w1.at[din, :hid].set(b_fold[0])

    def pad_w(w):
        r, c = w.shape
        return jnp.zeros((FEAT, FEAT), f32).at[:r, :c].set(w.astype(f32))

    def pad_b(b):
        return jnp.zeros((1, FEAT), f32).at[:, :b.shape[1]].set(b.astype(f32))

    return {
        "w1": w1.astype(bf16), "b1": pad_b(params["b_c1"]),
        "w2": pad_w(params["w_c2"]).astype(bf16), "b2": pad_b(params["b_c2"]),
        "wf1": pad_w(params["w_fc1"]).astype(bf16), "bf1": pad_b(params["b_fc1"]),
        "wf2": pad_w(params["w_fc2"]).astype(bf16), "bf2": pad_b(params["b_fc2"]),
    }


def prepare_x(x, n_pad):
    N, din = x.shape
    x_pad = jnp.zeros((n_pad, FEAT), jnp.float32)
    x_pad = x_pad.at[:N, :din].set(x)
    x_pad = x_pad.at[:N, din].set(1.0)     # bias column for folded input_proj
    return x_pad.astype(jnp.bfloat16)


def init_params(key, input_dim, hidden_dim, num_classes):
    ks = jax.random.split(key, 6)

    def lin(k, d_in, d_out):
        return (jax.random.normal(k, (d_in, d_out), jnp.float32)
                * (1.0 / jnp.sqrt(d_in)))

    h2 = hidden_dim // 2
    return {
        "w_in":  lin(ks[0], input_dim, hidden_dim),
        "b_in":  jnp.full((1, hidden_dim), 0.01, jnp.float32),
        "w_c1":  lin(ks[1], hidden_dim, hidden_dim),
        "b_c1":  jnp.full((1, hidden_dim), 0.02, jnp.float32),
        "w_c2":  lin(ks[2], hidden_dim, hidden_dim),
        "b_c2":  jnp.full((1, hidden_dim), 0.03, jnp.float32),
        "w_fc1": lin(ks[3], hidden_dim, h2),
        "b_fc1": jnp.full((1, h2), 0.04, jnp.float32),
        "w_fc2": lin(ks[4], h2, num_classes),
        "b_fc2": jnp.full((1, num_classes), 0.05, jnp.float32),
    }


def reference_forward(x, edge_index, batch, params, num_graphs):
    """Pure-JAX f32 reference of PrebuiltGraphNN('gcn', num_layers=2).forward."""
    N = x.shape[0]
    src, dst = edge_index[0], edge_index[1]
    loop = jnp.arange(N, dtype=edge_index.dtype)
    src = jnp.concatenate([src, loop])
    dst = jnp.concatenate([dst, loop])
    deg = jnp.zeros((N,), jnp.float32).at[dst].add(1.0)
    dinv = jnp.where(deg > 0, 1.0 / jnp.sqrt(deg), 0.0)
    norm = dinv[src] * dinv[dst]
    adj = jnp.zeros((N, N), jnp.float32).at[dst, src].add(norm)

    h = x @ params["w_in"] + params["b_in"]
    h = jnp.maximum(adj @ (h @ params["w_c1"]) + params["b_c1"], 0.0)
    h = jnp.maximum(adj @ (h @ params["w_c2"]) + params["b_c2"], 0.0)
    counts = jnp.zeros((num_graphs,), jnp.float32).at[batch].add(1.0)
    onehot = (batch[None, :] == jnp.arange(num_graphs)[:, None]).astype(jnp.float32)
    pool = onehot / jnp.maximum(counts, 1.0)[:, None]
    g = pool @ h
    g = jnp.maximum(g @ params["w_fc1"] + params["b_fc1"], 0.0)
    return g @ params["w_fc2"] + params["b_fc2"]


if __name__ == "__main__":
    input_dim, hidden_dim, num_classes = 8, 32, 4
    nodes_per_graph, num_graphs = 8, 2
    N = nodes_per_graph * num_graphs
    n_pad = _round_up(max(N, TK), TK)            # divisible by both TM and TK
    g_pad = max(8, _round_up(num_graphs, 8))     # sublane-aligned pooled rows

    key = jax.random.PRNGKey(0)
    k_x, k_p = jax.random.split(key)
    x = jax.random.normal(k_x, (N, input_dim), jnp.float32)

    # two undirected ring graphs (deterministic edge_index, PyG [2, E] layout)
    def ring_edges(offset, n):
        s = jnp.arange(n, dtype=jnp.int32) + offset
        d = (jnp.arange(n, dtype=jnp.int32) + 1) % n + offset
        return jnp.stack([jnp.concatenate([s, d]), jnp.concatenate([d, s])])

    edge_index = jnp.concatenate(
        [ring_edges(0, nodes_per_graph),
         ring_edges(nodes_per_graph, nodes_per_graph)], axis=1)
    batch = jnp.concatenate([jnp.zeros(nodes_per_graph, jnp.int32),
                             jnp.ones(nodes_per_graph, jnp.int32)])

    params = init_params(k_p, input_dim, hidden_dim, num_classes)

    # One-time setup hoisted out of the per-forward path.
    adj, pool = build_graph_matrices(edge_index, batch, N, num_graphs,
                                     n_pad, g_pad)
    prep = prepare_params(params)
    x_pad = prepare_x(x, n_pad)

    out = prebuilt_graph_nn_forward(x_pad, adj, pool, prep,
                                    num_graphs, num_classes)
    out = jax.block_until_ready(out)
    assert out.shape == (num_graphs, num_classes)

    ref = reference_forward(x, edge_index, batch, params, num_graphs)
    assert bool(jnp.allclose(out, ref, atol=5e-2, rtol=5e-2)), (
        "max abs err %f" % float(jnp.max(jnp.abs(out - ref))))
    print("KERNEL_OK")
</pallas_src>

<mosaic_0001>
module attributes {stable_mosaic.version = 11 : i64} {
  func.func @gcn_layer_kernel(%arg0: i32, %arg1: i32, %arg2: memref<256x512xbf16, #tpu.memory_space<vmem>>, %arg3: memref<512x128xbf16, #tpu.memory_space<vmem>>, %arg4: memref<128x128xbf16, #tpu.memory_space<vmem>>, %arg5: memref<1x128xf32, #tpu.memory_space<vmem>>, %arg6: memref<256x128xbf16, #tpu.memory_space<vmem>>, %arg7: memref<256x128xf32, #tpu.memory_space<vmem>>) attributes {dimension_semantics = [#tpu.dimension_semantics<parallel>, #tpu.dimension_semantics<arbitrary>], iteration_bounds = array<i64: 2, 1>, scalar_prefetch = 0 : i64, scratch_operands = 1 : i64, tpu.core_type = #tpu.core_type<tc>, window_params = [{transform_indices = @transform_0, window_bounds = array<i64: 256, 512>}, {transform_indices = @transform_1, window_bounds = array<i64: 512, 128>}, {pipeline_mode = #tpu.pipeline_mode<synchronous>, transform_indices = @transform_2, window_bounds = array<i64: 128, 128>}, {pipeline_mode = #tpu.pipeline_mode<synchronous>, transform_indices = @transform_3, window_bounds = array<i64: 1, 128>}, {transform_indices = @transform_4, window_bounds = array<i64: 256, 128>}]} {
    %c0_i32 = arith.constant 0 : i32
    %0 = arith.cmpi eq, %arg1, %c0_i32 : i32
    %1 = arith.extui %0 : i1 to i32
    %c0_i32_0 = arith.constant 0 : i32
    %2 = arith.cmpi ne, %1, %c0_i32_0 : i32
    scf.if %2 {
      %cst_10 = arith.constant 0.000000e+00 : f32
      %12 = vector.broadcast %cst_10 : f32 to vector<256x128xf32>
      %c0_11 = arith.constant 0 : index
      %c0_12 = arith.constant 0 : index
      %13 = vector.load %arg7[%c0_11, %c0_12] : memref<256x128xf32, #tpu.memory_space<vmem>>, vector<256x128xf32>
      tpu.vector_store %arg7[%c0_11, %c0_12], %12 {strides = array<i32>} : memref<256x128xf32, #tpu.memory_space<vmem>>, vector<256x128xf32>,
    } else {
    }
    %c0 = arith.constant 0 : index
    %c0_1 = arith.constant 0 : index
    %3 = vector.load %arg7[%c0, %c0_1] : memref<256x128xf32, #tpu.memory_space<vmem>>, vector<256x128xf32>
    %c0_2 = arith.constant 0 : index
    %c0_3 = arith.constant 0 : index
    %4 = vector.load %arg2[%c0_2, %c0_3] : memref<256x512xbf16, #tpu.memory_space<vmem>>, vector<256x512xbf16>
    %c0_4 = arith.constant 0 : index
    %c0_5 = arith.constant 0 : index
    %5 = vector.load %arg3[%c0_4, %c0_5] : memref<512x128xbf16, #tpu.memory_space<vmem>>, vector<512x128xbf16>
    %cst = arith.constant dense<0.000000e+00> : vector<256x128xf32>
    %6 = tpu.matmul %4, %5, %cst {dimension_numbers = #tpu.dot_dimension_numbers<[1], [0], [0], [1], [0, 0, 1, 1], [], []>} : vector<256x512xbf16>, vector<512x128xbf16>, vector<256x128xf32> -> vector<256x128xf32>
    %7 = arith.addf %3, %6 : vector<256x128xf32>
    %c0_6 = arith.constant 0 : index
    %c0_7 = arith.constant 0 : index
    %8 = vector.load %arg7[%c0_6, %c0_7] : memref<256x128xf32, #tpu.memory_space<vmem>>, vector<256x128xf32>
    tpu.vector_store %arg7[%c0_6, %c0_7], %7 {strides = array<i32>} : memref<256x128xf32, #tpu.memory_space<vmem>>, vector<256x128xf32>,
    %c0_i32_8 = arith.constant 0 : i32
    %9 = arith.cmpi eq, %arg1, %c0_i32_8 : i32
    %10 = arith.extui %9 : i1 to i32
    %c0_i32_9 = arith.constant 0 : i32
    %11 = arith.cmpi ne, %10, %c0_i32_9 : i32
    scf.if %11 {
      %c0_10 = arith.constant 0 : index
      %c0_11 = arith.constant 0 : index
      %12 = vector.load %arg7[%c0_10, %c0_11] : memref<256x128xf32, #tpu.memory_space<vmem>>, vector<256x128xf32>
      %13 = arith.truncf %12 : vector<256x128xf32> to vector<256x128xbf16>
      %c0_12 = arith.constant 0 : index
      %c0_13 = arith.constant 0 : index
      %14 = vector.load %arg4[%c0_12, %c0_13] : memref<128x128xbf16, #tpu.memory_space<vmem>>, vector<128x128xbf16>
      %cst_14 = arith.constant dense<0.000000e+00> : vector<256x128xf32>
      %15 = tpu.matmul %13, %14, %cst_14 {dimension_numbers = #tpu.dot_dimension_numbers<[1], [0], [0], [1], [0, 0, 1, 1], [], []>} : vector<256x128xbf16>, vector<128x128xbf16>, vector<256x128xf32> -> vector<256x128xf32>
      %c0_15 = arith.constant 0 : index
      %c0_16 = arith.constant 0 : index
      %16 = vector.load %arg5[%c0_15, %c0_16] : memref<1x128xf32, #tpu.memory_space<vmem>>, vector<1x128xf32>
      %17 = vector.broadcast %16 : vector<1x128xf32> to vector<256x128xf32>
      %18 = arith.addf %15, %17 : vector<256x128xf32>
      %cst_17 = arith.constant 0.000000e+00 : f32
      %19 = vector.broadcast %cst_17 : f32 to vector<256x128xf32>
      %20 = arith.maximumf %18, %19 : vector<256x128xf32>
      %21 = arith.truncf %20 : vector<256x128xf32> to vector<256x128xbf16>
      %c0_18 = arith.constant 0 : index
      %c0_19 = arith.constant 0 : index
      %22 = vector.load %arg6[%c0_18, %c0_19] : memref<256x128xbf16, #tpu.memory_space<vmem>>, vector<256x128xbf16>
      tpu.vector_store %arg6[%c0_18, %c0_19], %21 {strides = array<i32>} : memref<256x128xbf16, #tpu.memory_space<vmem>>, vector<256x128xbf16>,
    } else {
    }
    return
  }
  func.func @transform_0(%arg0: i32, %arg1: i32) -> (i32, i32) {
    %c0_i32 = arith.constant 0 : i32
    return %arg0, %arg1 : i32, i32
  }
  func.func @transform_1(%arg0: i32, %arg1: i32) -> (i32, i32) {
    %c0_i32 = arith.constant 0 : i32
    %c0_i32_0 = arith.constant 0 : i32
    return %arg1, %c0_i32 : i32, i32
  }
  func.func @transform_2(%arg0: i32, %arg1: i32) -> (i32, i32) {
    %c0_i32 = arith.constant 0 : i32
    %c0_i32_0 = arith.constant 0 : i32
    %c0_i32_1 = arith.constant 0 : i32
    return %c0_i32, %c0_i32_0 : i32, i32
  }
  func.func @transform_3(%arg0: i32, %arg1: i32) -> (i32, i32) {
    %c0_i32 = arith.constant 0 : i32
    %c0_i32_0 = arith.constant 0 : i32
    %c0_i32_1 = arith.constant 0 : i32
    return %c0_i32, %c0_i32_0 : i32, i32
  }
  func.func @transform_4(%arg0: i32, %arg1: i32) -> (i32, i32) {
    %c0_i32 = arith.constant 0 : i32
    %c0_i32_0 = arith.constant 0 : i32
    return %arg0, %c0_i32 : i32, i32
  }
}

</mosaic_0001>

<bundles_post_ra>
// kernel: tpu_custom_call.1
= control target key start
LH: loop header
LB: loop body
LE: loop exit
PB: predicated region body
PF: predicated region fallthrough
CT: control target
= control target key end

     0   :  { %s3209_s0 = inlined_call_operand.hbm [shape: bf16[512,512], index: 0, kind: input, shape index: {}]   ;;  %s3210_s1 = inlined_call_operand.hbm [shape: bf16[512,128], index: 1, kind: input, shape index: {}]   ;;  %s3211_s2 = inlined_call_operand.hbm [shape: bf16[128,128], index: 2, kind: input, shape index: {}]   ;;  %s3212_s3 = inlined_call_operand.vmem [shape: f32[1,128], index: 3, kind: input, shape index: {}]   ;;  %s3213_s4 = inlined_call_operand.hbm [shape: bf16[512,128], index: 4, kind: output, shape index: {}]  }
   0x1   :  { %3214 = sst [smem:[#allocation13_spill]] %s3210_s1 }
   0x2   :  { %3215 = sst [smem:[#allocation14_spill]] %s3211_s2 }
   0x3   :  { %9 = vsyncpa [#allocation4], 0 }
   0x4   :  { %11 = vsyncpa [#allocation4 + $0x1], 0 }
   0x5   :  { %12 = vsyncpa [#allocation7], 0 }
   0x6   :  { %13 = vsyncpa [#allocation5], 0 }
   0x7   :  { %15 = vsyncpa [#allocation5 + $0x1], 0  ;;  %s2796_s15 = smov 0   ;;  %s2798_s16 = smov 0  }
   0x8   :  { %s2800_s17 = smov 0   ;;  %s2802_s18 = smov 0  }
   0x9   :  { %s2804_s19 = smov 0   ;;  %s2806_s20 = smov 0  }
   0xa LB: > { %s1833_s21 = sadd.s32 4294967295, %s2761_s20   ;;  %s1834_s22 = sadd.s32 4294967294, %s2761_s20   ;;  %s2761_s20 = sphi %s2806_s20, %s21_s20   ;;  %s2757_s19 = sphi %s2804_s19, %s3229_s19   ;;  %s2753_s18 = sphi %s2802_s18, %s3228_s18   ;;  %s2749_s17 = sphi %s2800_s17, %s3227_s17   ;;  %s2745_s16 = sphi %s2798_s16, %s3226_s16   ;;  %s2741_s15 = sphi %s2796_s15, %s3225_s15  }
   0xb   : > { %p55_p0 = scmp.ne.s32.totalorder %s2745_s16, %s2741_s15  ;;  %p2830_p1 = scmp.eq.s32.totalorder %s1833_s21, 0 }
   0xc   : > { %p2834_p2 = scmp.eq.s32.totalorder %s1833_s21, 1  ;;  %p153_p3 = scmp.eq.s32.totalorder %s1834_s22, 1 }
   0xd   : > { %p2840_p4 = por %p2830_p1, %p55_p0  ;;  %p1835_p5 = scmp.ge.s32.totalorder %s2761_s20, 1 }
   0xe   : > { %p2845_p6 = por %p153_p3, %p55_p0  ;;  %p160_p7 = scmp.lt.s32.totalorder %s2761_s20, 3 }
   0xf   : > { %s3220_s1 = sld [smem:[#allocation13_spill]]  ;;  %s2763_s5 = smov [#allocation6]  }
  0x10   : > { %p2853_p8 = pnand %p1835_p5, %p160_p7  ;;  %s176_s6 = sshll.u32 %s2763_s5, 4  ;;  %s177_s6 = int_to_ptr.vmem [resolvable:$true] %s176_s6 }
  0x11   : > { %p1838_p11 = scmp.ge.s32.totalorder %s2761_s20, 2  ;;  %s3222_s2 = sld [smem:[#allocation14_spill]] }
  0x12   : > { %p2507_p9 = pneg %p2853_p8  ;;  %s2764_s10 = smov 64  }
  0x13   : > { %s2765_s11 = smov 4   ;;  %s2766_s12 = smov [#allocation8]  }
  0x14   : > { %p2508_p10 = pnand %p2507_p9, %p2830_p1  ;;  %s190_s13 = sshll.u32 %s2766_s12, 4  ;;  %s191_s13 = int_to_ptr.vmem [resolvable:$true] %s190_s13 }
  0x15   : > { %s174_s29 = sshll.u32 %s3220_s1, 4  ;;  %s33_s14 = sadd.s32 1, %s2757_s19  ;;  %s175_s29 = int_to_ptr.hbm [resolvable:$true] %s174_s29 }
  0x16   : > { %2510 = dma.hbm_to_vmem [thread:$0]  (!%p2508_p10), %s175_s29, 4096, %s177_s6, [#allocation7], %s2764_s10, %s2764_s10, %s2765_s11  }
  0x17   : > { %s188_s9 = sshll.u32 %s3222_s2, 4  ;;  %s42_s21 = sadd.s32 1, %s2749_s17  ;;  %s189_s9 = int_to_ptr.hbm [resolvable:$true] %s188_s9 }
  0x18   : > { %2513 = dma.hbm_to_vmem [thread:$0]  (!%p2508_p10), %s189_s9, 1024, %s191_s13, [#allocation7], %s2764_s10, %s2764_s10, %s2765_s11  }
  0x19   : > { %p35_p12 = scmp.ge.s32.totalorder %s33_s14, 2  ;;  %p49_p13 = scmp.ne.s32.totalorder %s2749_s17, %s2745_s16 }
  0x1a   : > { %p50_p0 = scmp.eq.s32.totalorder %s2761_s20, 0  ;;  %p2524_p3 = scmp.lt.s32.totalorder %s2761_s20, 2 }
  0x1b   : > { %s3231_s14 = smov (%p35_p12, %s33_s14), 0  ;;  %p2879_p7 = por %p2834_p2, %p49_p13 }
  0x1c   : > { %p2873_p5 = por %p50_p0, %p49_p13  ;;  %s37_s28 = ssub.s32 %s2757_s19, %s3231_s14 }
  0x1d   : > { %s207_s29 = sand.u32 1, %s2749_s17   ;;  %p40_p9 = scmp.eq.s32.totalorder %s37_s28, 0 }
  0x1e   : > { %s1839_s5 = sshll.u32 %s207_s29, 9  ;;  %s2270_s6 = sshll.u32 %s2757_s19, 9 }
  0x1f   : > { %s2888_s7 = scalar_select %p40_p9, %s2749_s17, %s42_s21  }
  0x20   : > { %s219_s10 = scalar_lea.hbm %s3209_s0, %s2270_s6  ;;  %s211_s12 = scalar_lea.vmem [#allocation3], %s1839_s5 }
  0x21   : > { %s220_s11 = sshll.u32 %s219_s10, 4  ;;  %s222_s13 = sshll.u32 %s211_s12, 4  ;;  %s221_s11 = int_to_ptr.hbm [resolvable:$true] %s220_s11  ;;  %s223_s13 = int_to_ptr.vmem [resolvable:$true] %s222_s13 }
  0x22   : > { %p2515_p2 = pnand %p2524_p3, %p2873_p5  ;;  %s208_s24 = scalar_lea.sflag [#allocation4], %s207_s29 }
  0x23   : > { %s2767_s1 = smov 256   ;;  %s2768_s2 = smov 16  }
  0x24   : > { %2517 = dma.hbm_to_vmem [thread:$0]  (!%p2515_p2), %s221_s11, 8192, %s223_s13, %s208_s24, %s2767_s1, %s2767_s1, %s2768_s2  }
  0x25   : > { %234 = sbr.rel (%p2853_p8) target bundleno = 672 (0x2a0), region = 36  ;;  %s2900_s21 = sand.u32 (!%p2853_p8), 1, %s2745_s16  }
  0x26   : > { %s1844_s28 = sshll.u32 (!%p2853_p8), %s2900_s21, 9  ;;  %s237_s5 = scalar_lea.sflag (!%p2853_p8), [#allocation4], %s2900_s21 }
  0x27   : > { %s2904_s6 = scalar_lea.vmem (!%p2853_p8), [#allocation3], %s1844_s28 }
  0x2a   : > { %2728 = dma.done.wait (%p2840_p4), %s237_s5, 8192  }
  0x2b   : > { %2730 = vsyncadd (%p2840_p4), %s237_s5, 4294959104 }
  0x2c   : > { %2732 = dma.done.wait (%p2830_p1), [#allocation7], 5120  }
  0x2d   : > { %2734 = vsyncadd (%p2830_p1), [#allocation7], 4294962176  ;;  %v2342_v0 = vld [vmem:[#allocation6 + $0x38] sm:$0xff]  ;;  %v2341_v1 = vld [vmem:[#allocation6 + $0x30] sm:$0xff]  ;;  %s1847_s23 = sshll.u32 %s2900_s21, 7  ;;  %s2375_s30 = sshll.u32 %s2753_s18, 7 }
  0x2e   : > { %2471 = vmatpush.bf16.msra.mxu1 %v2342_v0  ;;  %2472 = vmatpush.bf16.msra.mxu2 %v2342_v0  ;;  %v2340_v2 = vld [vmem:[#allocation6 + $0x28] sm:$0xff]  ;;  %v2339_v3 = vld [vmem:[#allocation6 + $0x20] sm:$0xff]  ;;  %v2338_v4 = vld [vmem:[#allocation6 + $0x18] sm:$0xff]  ;;  %s3110_s25 = scalar_lea.vmem [#allocation9], %s1847_s23  ;;  %s1724_s8 = scalar_lea.hbm %s3213_s4, %s2375_s30 }
  0x2f   : > { %2473 = vmatpush.bf16.msra.mxu3 %v2342_v0  ;;  %988 = vmatpush.bf16.msra.mxu0 %v2342_v0  ;;  %v2337_v5 = vld [vmem:[#allocation6 + $0x10] sm:$0xff]  ;;  %v2336_v6 = vld [vmem:[#allocation6 + $0x8] sm:$0xff]  ;;  %v2335_v7 = vld [vmem:[#allocation6] sm:$0xff]  ;;  %s1725_s9 = sshll.u32 %s3110_s25, 4  ;;  %s1727_s10 = sshll.u32 %s1724_s8, 4  ;;  %s1726_s9 = int_to_ptr.vmem [resolvable:$true] %s1725_s9  ;;  %s1728_s10 = int_to_ptr.hbm [resolvable:$true] %s1727_s10 }
  0x30   : > { %v1914_v8 = vld [vmem:[%s2904_s6 + $0x80] sm:$0xf]  ;;  %v2289_v9 = vld [vmem:[%s2904_s6 + $0x8c] sm:$0xf0]  ;;  %v2358_v14 = vld [vmem:[#allocation6 + $0xb8] sm:$0xff]  ;;  %s1713_s11 = scalar_lea.sflag [#allocation5], %s2900_s21 }
  0x31   : > { %v1978_v10 = vld [vmem:[%s2904_s6 + $0x100] sm:$0xf]  ;;  %v2305_v11 = vld [vmem:[%s2904_s6 + $0x10c] sm:$0xf0]  ;;  %v2366_v15 = vld [vmem:[#allocation6 + $0xf8] sm:$0xff]  ;;  %v1915_v17 = vor.u32 %v2289_v9, %v1914_v8  ;;  %s2689_s18 = sshra.s32 %s1728_s10, 4  ;;  %s2690_s18 = int_to_ptr.hbm [resolvable:$true] %s2689_s18 }
  0x32   : > { %2474 = vmatpush.bf16.msra.mxu1 %v2341_v1  ;;  %2475 = vmatpush.bf16.msra.mxu2 %v2341_v1  ;;  %v2042_v12 = vld [vmem:[%s2904_s6 + $0x180] sm:$0xf]  ;;  %v2321_v13 = vld [vmem:[%s2904_s6 + $0x18c] sm:$0xf0]  ;;  %v2350_v16 = vld [vmem:[#allocation6 + $0x78] sm:$0xff]  ;;  %v1979_v18 = vor.u32 %v2305_v11, %v1978_v10  ;;  %s2691_s12 = scalar_lea.hbm %s2690_s18, 128  ;;  %p2696_p10 = scmp.lt.s32.totalorder %s2690_s18, %s3213_s4 }
  0x33   : > { %2476 = vmatpush.bf16.msra.mxu3 %v2341_v1  ;;  %989 = vmatpush.bf16.msra.mxu0 %v2341_v1  ;;  %v2043_v19 = vor.u32 %v2321_v13, %v2042_v12  ;;  %v2357_v20 = vld [vmem:[#allocation6 + $0xb0] sm:$0xff]  ;;  %v2356_v23 = vld [vmem:[#allocation6 + $0xa8] sm:$0xff]  ;;  %v2355_v26 = vld [vmem:[#allocation6 + $0xa0] sm:$0xff]  ;;  %p2692_p1 = scmp.ne.s32.totalorder %s2690_s18, %s2691_s12  ;;  %s2695_s28 = scalar_lea.hbm %s3213_s4, 256 }
  0x34   : > { %v2365_v21 = vld [vmem:[#allocation6 + $0xf0] sm:$0xff]  ;;  %v2364_v24 = vld [vmem:[#allocation6 + $0xe8] sm:$0xff]  ;;  %v2363_v27 = vld [vmem:[#allocation6 + $0xe0] sm:$0xff]  ;;  %p2697_p12 = scmp.lt.s32.totalorder %s2695_s28, %s2691_s12 }
  0x35   : > { %v2349_v22 = vld [vmem:[#allocation6 + $0x70] sm:$0xff]  ;;  %v2348_v25 = vld [vmem:[#allocation6 + $0x68] sm:$0xff]  ;;  %v2347_v28 = vld [vmem:[#allocation6 + $0x60] sm:$0xff]  ;;  %p2693_p4 = pnand %p2692_p1, %p2879_p7 }
  0x36   : > { %2477 = vmatpush.bf16.msra.mxu1 %v2340_v2  ;;  %2478 = vmatpush.bf16.msra.mxu2 %v2340_v2  ;;  %v1930_v29 = vld [vmem:[%s2904_s6 + $0xa0] sm:$0xf]  ;;  %v2293_v30 = vld [vmem:[%s2904_s6 + $0xac] sm:$0xf0]  ;;  %v2354_v35 = vld [vmem:[#allocation6 + $0x98] sm:$0xff]  ;;  %p2698_p13 = por %p2697_p12, %p2696_p10 }
  0x37   : > { %2479 = vmatpush.bf16.msra.mxu3 %v2340_v2  ;;  %990 = vmatpush.bf16.msra.mxu0 %v2340_v2  ;;  %v1994_v31 = vld [vmem:[%s2904_s6 + $0x120] sm:$0xf]  ;;  %v2309_v32 = vld [vmem:[%s2904_s6 + $0x12c] sm:$0xf0]  ;;  %v2362_v36 = vld [vmem:[#allocation6 + $0xd8] sm:$0xff]  ;;  %v1931_v38 = vor.u32 %v2293_v30, %v1930_v29  ;;  %p2694_p8 = pneg %p2693_p4 }
  0x38   : > { %v2058_v33 = vld [vmem:[%s2904_s6 + $0x1a0] sm:$0xf]  ;;  %v2325_v34 = vld [vmem:[%s2904_s6 + $0x1ac] sm:$0xf0]  ;;  %v2346_v37 = vld [vmem:[#allocation6 + $0x58] sm:$0xff]  ;;  %v1995_v39 = vor.u32 %v2309_v32, %v1994_v31 }
  0x39   : > { %v2059_v40 = vor.u32 %v2325_v34, %v2058_v33  ;;  %v2353_v41 = vld [vmem:[#allocation6 + $0x90] sm:$0xff]  ;;  %v2352_v44 = vld [vmem:[#allocation6 + $0x88] sm:$0xff]  ;;  %v1850_v45 = vld [vmem:[%s2904_s6] sm:$0xf]  ;;  %p2699_p0 = pnand %p2698_p13, %p2694_p8 }
  0x3a   : > { %2480 = vmatpush.bf16.msra.mxu1 %v2339_v3  ;;  %2481 = vmatpush.bf16.msra.mxu2 %v2339_v3  ;;  %v2361_v42 = vld [vmem:[#allocation6 + $0xd0] sm:$0xff]  ;;  %v2360_v46 = vld [vmem:[#allocation6 + $0xc8] sm:$0xff]  ;;  %v2351_v50 = vld [vmem:[#allocation6 + $0x80] sm:$0xff] }
  0x3b   : > { %2482 = vmatpush.bf16.msra.mxu3 %v2339_v3  ;;  %991 = vmatpush.bf16.msra.mxu0 %v2339_v3  ;;  %v2345_v43 = vld [vmem:[#allocation6 + $0x50] sm:$0xff]  ;;  %v2344_v47 = vld [vmem:[#allocation6 + $0x48] sm:$0xff]  ;;  %v2359_v51 = vld [vmem:[#allocation6 + $0xc0] sm:$0xff] }
  0x3c   : > { %v2273_v48 = vld [vmem:[%s2904_s6 + $0xc] sm:$0xf0]  ;;  %v2343_v52 = vld [vmem:[#allocation6 + $0x40] sm:$0xff]  ;;  %v2276_v29 = vld [vmem:[%s2904_s6 + $0x2c] sm:$0xf] }
  0x3d   : > { %v1851_v49 = vor.u32 %v2273_v48, %v1850_v45  ;;  %v1946_v53 = vld [vmem:[%s2904_s6 + $0xc0] sm:$0xf]  ;;  %v2297_v54 = vld [vmem:[%s2904_s6 + $0xcc] sm:$0xf0]  ;;  %v2271_v13 = vld [vmem:[%s2904_s6 + $0x4] sm:$0xf] }
  0x3e   : > { %2483 = vmatpush.bf16.msra.mxu1 %v2338_v4  ;;  %2484 = vmatpush.bf16.msra.mxu2 %v2338_v4  ;;  %v2010_v55 = vld [vmem:[%s2904_s6 + $0x140] sm:$0xf]  ;;  %v2313_v56 = vld [vmem:[%s2904_s6 + $0x14c] sm:$0xf0]  ;;  %v1947_v59 = vor.u32 %v2297_v54, %v1946_v53  ;;  %v1876_v30 = vld [vmem:[%s2904_s6 + $0x38] sm:$0xf0] }
  0x3f   : > { %2485 = vmatpush.bf16.msra.mxu3 %v2338_v4  ;;  %992 = vmatpush.bf16.msra.mxu0 %v2338_v4  ;;  %v2074_v57 = vld [vmem:[%s2904_s6 + $0x1c0] sm:$0xf]  ;;  %v2329_v58 = vld [vmem:[%s2904_s6 + $0x1cc] sm:$0xf0]  ;;  %v2011_v60 = vor.u32 %v2313_v56, %v2010_v55  ;;  %v1879_v33 = vor.u32 %v2276_v29, %v1876_v30  ;;  %v2279_v34 = vld [vmem:[%s2904_s6 + $0x44] sm:$0xf] }
  0x40   : > { %v2075_v61 = vor.u32 %v2329_v58, %v2074_v57  ;;  %v1866_v62 = vld [vmem:[%s2904_s6 + $0x20] sm:$0xf]  ;;  %v2277_v63 = vld [vmem:[%s2904_s6 + $0x2c] sm:$0xf0]  ;;  %v1906_v45 = vld [vmem:[%s2904_s6 + $0x68] sm:$0xf] }
  0x41   : > { %v1867_v0 = vor.u32 %v2277_v63, %v1866_v62  ;;  %v1962_v1 = vld [vmem:[%s2904_s6 + $0xe0] sm:$0xf]  ;;  %v2301_v2 = vld [vmem:[%s2904_s6 + $0xec] sm:$0xf0]  ;;  %v1908_v48 = vld [vmem:[%s2904_s6 + $0x78] sm:$0xf0] }
  0x42   : > { %2486 = vmatpush.bf16.msra.mxu1 %v2337_v5  ;;  %2487 = vmatpush.bf16.msra.mxu2 %v2337_v5  ;;  %v2026_v3 = vld [vmem:[%s2904_s6 + $0x160] sm:$0xf]  ;;  %v2317_v4 = vld [vmem:[%s2904_s6 + $0x16c] sm:$0xf0]  ;;  %v2287_v54 = vld [vmem:[%s2904_s6 + $0x84] sm:$0xf] }
  0x43   : > { %2488 = vmatpush.bf16.msra.mxu3 %v2337_v5  ;;  %993 = vmatpush.bf16.msra.mxu0 %v2337_v5  ;;  %v2090_v5 = vld [vmem:[%s2904_s6 + $0x1e0] sm:$0xf]  ;;  %v2027_v8 = vor.u32 %v2317_v4, %v2026_v3  ;;  %v2281_v11 = vld [vmem:[%s2904_s6 + $0x4c] sm:$0xf0]  ;;  %v1916_v55 = vld [vmem:[%s2904_s6 + $0x90] sm:$0xf0] }
  0x44   : > { %v1882_v10 = vld [vmem:[%s2904_s6 + $0x40] sm:$0xf]  ;;  %v2373_v53 = vld [vmem:[#allocation8 + $0x30] sm:$0xff]  ;;  %v1922_v56 = vld [vmem:[%s2904_s6 + $0x88] sm:$0xf] }
  0x45   : > { %v1883_v12 = vor.u32 %v2281_v11, %v1882_v10  ;;  %v2290_v57 = vld [vmem:[%s2904_s6 + $0x94] sm:$0xf0]  ;;  %v2288_v58 = vld [vmem:[%s2904_s6 + $0x8c] sm:$0xf]  ;;  %v2371_v4 = vld [vmem:[#allocation8 + $0x20] sm:$0xff] }
  0x46   : > { %2489 = vmatpush.bf16.msra.mxu1 %v2336_v6  ;;  %2490 = vmatpush.bf16.msra.mxu2 %v2336_v6  ;;  %v1940_v10 = vld [vmem:[%s2904_s6 + $0xb8] sm:$0xf0] }
  0x47   : > { %2491 = vmatpush.bf16.msra.mxu3 %v2336_v6  ;;  %994 = vmatpush.bf16.msra.mxu0 %v2336_v6  ;;  %v2333_v6 = vld [vmem:[%s2904_s6 + $0x1ec] sm:$0xf0] }
  0x48   : > { %v2091_v9 = vor.u32 %v2333_v6, %v2090_v5  ;;  %v2291_v5 = vld [vmem:[%s2904_s6 + $0xa4] sm:$0xf]  ;;  %v1932_v6 = vld [vmem:[%s2904_s6 + $0xb0] sm:$0xf0] }
  0x4a   : > { %2492 = vmatpush.bf16.msra.mxu1 %v2335_v7  ;;  %2493 = vmatpush.bf16.msra.mxu2 %v2335_v7 }
  0x4b   : > { %2494 = vmatpush.bf16.msra.mxu3 %v2335_v7  ;;  %995 = vmatpush.bf16.msra.mxu0 %v2335_v7  ;;  %v1963_v7 = vor.u32 %v2301_v2, %v1962_v1 }
  0x4d   : > { %1016 = vmatmul.bf16.vlgmr.msra.gmra.mxu1 %v1915_v17  ;;  %1036 = vmatmul.bf16.vlgmr.msra.gmra.mxu2 %v1979_v18  ;;  %v2272_v17 = vld [vmem:[%s2904_s6 + $0xc] sm:$0xf]  ;;  %v1860_v18 = vld [vmem:[%s2904_s6 + $0x18] sm:$0xf0] }
  0x4e   : > { %1166 = vmatpush.bf16.msrb.mxu2 %v2358_v14  ;;  %1077 = vmatpush.bf16.msrb.mxu1 %v2350_v16  ;;  %v1852_v14 = vld [vmem:[%s2904_s6 + $0x10] sm:$0xf0]  ;;  %v2274_v16 = vld [vmem:[%s2904_s6 + $0x14] sm:$0xf0] }
  0x4f   : > { %1255 = vmatpush.bf16.msrb.mxu3 %v2366_v15  ;;  %996 = vmatmul.bf16.vlgmr.msra.gmra.mxu0 %v1851_v49  ;;  %v1858_v15 = vld [vmem:[%s2904_s6 + $0x8] sm:$0xf] }
  0x50   : > { %1056 = vmatmul.bf16.vlgmr.msra.gmra.mxu3 %v2043_v19  ;;  %v1855_v19 = vor.u32 %v2271_v13, %v1852_v14  ;;  %v1935_v13 = vor.u32 %v2291_v5, %v1932_v6 }
  0x52   : > { %1167 = vmatpush.bf16.msrb.mxu2 %v2357_v20  ;;  %1078 = vmatpush.bf16.msrb.mxu1 %v2349_v22  ;;  %v1859_v20 = vor.u32 %v2274_v16, %v1858_v15  ;;  %v1898_v22 = vld [vmem:[%s2904_s6 + $0x60] sm:$0xf] }
  0x53   : > { %1256 = vmatpush.bf16.msrb.mxu3 %v2365_v21  ;;  %v1863_v21 = vor.u32 %v2272_v17, %v1860_v18  ;;  %v2370_v17 = vld [vmem:[#allocation8 + $0x18] sm:$0xff] }
  0x56   : > { %1168 = vmatpush.bf16.msrb.mxu2 %v2356_v23  ;;  %1079 = vmatpush.bf16.msrb.mxu1 %v2348_v25  ;;  %v2285_v23 = vld [vmem:[%s2904_s6 + $0x6c] sm:$0xf0]  ;;  %v2275_v25 = vld [vmem:[%s2904_s6 + $0x24] sm:$0xf] }
  0x57   : > { %1257 = vmatpush.bf16.msrb.mxu3 %v2364_v24  ;;  %v1899_v24 = vor.u32 %v2285_v23, %v1898_v22  ;;  %v2295_v22 = vld [vmem:[%s2904_s6 + $0xc4] sm:$0xf]  ;;  %v1948_v23 = vld [vmem:[%s2904_s6 + $0xd0] sm:$0xf0] }
  0x58   : > { %v1951_v30 = vor.u32 %v2295_v22, %v1948_v23  ;;  %v2310_v22 = vld [vmem:[%s2904_s6 + $0x134] sm:$0xf0] }
  0x5a   : > { %1169 = vmatpush.bf16.msrb.mxu2 %v2355_v26  ;;  %1080 = vmatpush.bf16.msrb.mxu1 %v2347_v28  ;;  %v1868_v26 = vld [vmem:[%s2904_s6 + $0x30] sm:$0xf0]  ;;  %v2278_v28 = vld [vmem:[%s2904_s6 + $0x34] sm:$0xf0] }
  0x5b   : > { %1258 = vmatpush.bf16.msrb.mxu3 %v2363_v27  ;;  %v1874_v27 = vld [vmem:[%s2904_s6 + $0x28] sm:$0xf]  ;;  %v1871_v31 = vor.u32 %v2275_v25, %v1868_v26  ;;  %v2298_v25 = vld [vmem:[%s2904_s6 + $0xd4] sm:$0xf0]  ;;  %v2296_v26 = vld [vmem:[%s2904_s6 + $0xcc] sm:$0xf] }
  0x5c   : > { %v1875_v32 = vor.u32 %v2278_v28, %v1874_v27  ;;  %v1956_v27 = vld [vmem:[%s2904_s6 + $0xd8] sm:$0xf0] }
  0x5d   : > { %1021 = vmatmul.bf16.gmra.mxu1 %v1931_v38  ;;  %1041 = vmatmul.bf16.gmra.mxu2 %v1995_v39  ;;  %v2280_v38 = vld [vmem:[%s2904_s6 + $0x4c] sm:$0xf]  ;;  %v1892_v39 = vld [vmem:[%s2904_s6 + $0x58] sm:$0xf0] }
  0x5e   : > { %1170 = vmatpush.bf16.msrb.mxu2 %v2354_v35  ;;  %1081 = vmatpush.bf16.msrb.mxu1 %v2346_v37  ;;  %v1884_v35 = vld [vmem:[%s2904_s6 + $0x50] sm:$0xf0]  ;;  %v2282_v37 = vld [vmem:[%s2904_s6 + $0x54] sm:$0xf0] }
  0x5f   : > { %1259 = vmatpush.bf16.msrb.mxu3 %v2362_v36  ;;  %1001 = vmatmul.bf16.gmra.mxu0 %v1867_v0  ;;  %v1890_v36 = vld [vmem:[%s2904_s6 + $0x48] sm:$0xf] }
  0x60   : > { %1061 = vmatmul.bf16.gmra.mxu3 %v2059_v40  ;;  %v1887_v40 = vor.u32 %v2279_v34, %v1884_v35  ;;  %v2372_v0 = vld [vmem:[#allocation8 + $0x28] sm:$0xff] }
  0x61   : > { %v2368_v34 = vld [vmem:[#allocation8 + $0x8] sm:$0xff] }
  0x62   : > { %1171 = vmatpush.bf16.msrb.mxu2 %v2353_v41  ;;  %1082 = vmatpush.bf16.msrb.mxu1 %v2345_v43  ;;  %v1891_v41 = vor.u32 %v2282_v37, %v1890_v36  ;;  %v2283_v43 = vld [vmem:[%s2904_s6 + $0x64] sm:$0xf] }
  0x63   : > { %1260 = vmatpush.bf16.msrb.mxu3 %v2361_v42  ;;  %v1895_v42 = vor.u32 %v2280_v38, %v1892_v39  ;;  %v2367_v38 = vld [vmem:[#allocation8] sm:$0xff] }
  0x64   : > { %v2299_v39 = vld [vmem:[%s2904_s6 + $0xe4] sm:$0xf] }
  0x66   : > { %1172 = vmatpush.bf16.msrb.mxu2 %v2352_v44  ;;  %1083 = vmatpush.bf16.msrb.mxu1 %v2344_v47  ;;  %v1900_v44 = vld [vmem:[%s2904_s6 + $0x70] sm:$0xf0]  ;;  %v2284_v47 = vld [vmem:[%s2904_s6 + $0x6c] sm:$0xf] }
  0x67   : > { %1261 = vmatpush.bf16.msrb.mxu3 %v2360_v46  ;;  %v2286_v46 = vld [vmem:[%s2904_s6 + $0x74] sm:$0xf0]  ;;  %v1903_v49 = vor.u32 %v2283_v43, %v1900_v44  ;;  %v2300_v43 = vld [vmem:[%s2904_s6 + $0xec] sm:$0xf]  ;;  %v1972_v44 = vld [vmem:[%s2904_s6 + $0xf8] sm:$0xf0] }
  0x6a   : > { %1173 = vmatpush.bf16.msrb.mxu2 %v2351_v50  ;;  %1084 = vmatpush.bf16.msrb.mxu1 %v2343_v52  ;;  %v1907_v50 = vor.u32 %v2286_v46, %v1906_v45  ;;  %v2374_v52 = vld [vmem:[#allocation8 + $0x38] sm:$0xff] }
  0x6b   : > { %1262 = vmatpush.bf16.msrb.mxu3 %v2359_v51  ;;  %v1911_v51 = vor.u32 %v2284_v47, %v1908_v48  ;;  %1527 = vmatpush.bf16.msrb.mxu0 %v2374_v52 }
  0x6d   : > { %1026 = vmatmul.bf16.gmra.mxu1 %v1947_v59  ;;  %1046 = vmatmul.bf16.gmra.mxu2 %v2011_v60  ;;  %v1924_v59 = vld [vmem:[%s2904_s6 + $0x98] sm:$0xf0]  ;;  %v1919_v60 = vor.u32 %v2287_v54, %v1916_v55  ;;  %v2303_v55 = vld [vmem:[%s2904_s6 + $0x104] sm:$0xf] }
  0x6e   : > { %v1927_v63 = vor.u32 %v2288_v58, %v1924_v59  ;;  %v2306_v58 = vld [vmem:[%s2904_s6 + $0x114] sm:$0xf0]  ;;  %v2304_v59 = vld [vmem:[%s2904_s6 + $0x10c] sm:$0xf] }
  0x6f   : > { %1006 = vmatmul.bf16.gmra.mxu0 %v1883_v12 }
  0x70   : > { %1066 = vmatmul.bf16.gmra.mxu3 %v2075_v61  ;;  %1528 = vmatpush.bf16.msrb.mxu0 %v2373_v53  ;;  %v1923_v61 = vor.u32 %v2290_v57, %v1922_v56  ;;  %v1980_v56 = vld [vmem:[%s2904_s6 + $0x110] sm:$0xf0]  ;;  %v1986_v57 = vld [vmem:[%s2904_s6 + $0x108] sm:$0xf] }
  0x74   : > { %1529 = vmatpush.bf16.msrb.mxu0 %v2372_v0  ;;  %v1983_v0 = vor.u32 %v2303_v55, %v1980_v56  ;;  %v2012_v55 = vld [vmem:[%s2904_s6 + $0x150] sm:$0xf0]  ;;  %v2018_v56 = vld [vmem:[%s2904_s6 + $0x148] sm:$0xf] }
  0x78   : > { %1530 = vmatpush.bf16.msrb.mxu0 %v2371_v4  ;;  %v1987_v4 = vor.u32 %v2306_v58, %v1986_v57  ;;  %v2314_v57 = vld [vmem:[%s2904_s6 + $0x154] sm:$0xf0] }
  0x7c   : > { %1531 = vmatpush.bf16.msrb.mxu0 %v2370_v17  ;;  %v1996_v17 = vld [vmem:[%s2904_s6 + $0x130] sm:$0xf0] }
  0x7d   : > { %1031 = vmatmul.bf16.gmra.mxu1 %v1963_v7  ;;  %1051 = vmatmul.bf16.gmra.mxu2 %v2027_v8  ;;  %v1938_v7 = vld [vmem:[%s2904_s6 + $0xa8] sm:$0xf]  ;;  %v2294_v8 = vld [vmem:[%s2904_s6 + $0xb4] sm:$0xf0] }
  0x7e   : > { %v1939_v14 = vor.u32 %v2294_v8, %v1938_v7 }
  0x7f   : > { %1011 = vmatmul.bf16.gmra.mxu0 %v1899_v24  ;;  %v1954_v24 = vld [vmem:[%s2904_s6 + $0xc8] sm:$0xf] }
  0x80   : > { %1071 = vmatmul.bf16.gmra.mxu3 %v2091_v9  ;;  %v2292_v9 = vld [vmem:[%s2904_s6 + $0xac] sm:$0xf] }
  0x81   : > { %v1943_v16 = vor.u32 %v2292_v9, %v1940_v10 }
  0x8d   : > { %1085 = vmatmul.bf16.vlgmr.msrb.gmra.mxu1 %v1855_v19  ;;  %1174 = vmatmul.bf16.vlgmr.msrb.gmra.mxu2 %v1859_v20 }
  0x90   : > { %1263 = vmatmul.bf16.vlgmr.msrb.gmra.mxu3 %v1863_v21  ;;  %v2369_v21 = vld [vmem:[#allocation8 + $0x10] sm:$0xff] }
  0x91   : > { %1532 = vmatpush.bf16.msrb.mxu0 %v2369_v21  ;;  %v2002_v21 = vld [vmem:[%s2904_s6 + $0x128] sm:$0xf] }
  0x95   : > { %1533 = vmatpush.bf16.msrb.mxu0 %v2368_v34  ;;  %v2003_v34 = vor.u32 %v2310_v22, %v2002_v21 }
  0x99   : > { %1534 = vmatpush.bf16.msrb.mxu0 %v2367_v38 }
  0x9d   : > { %1090 = vmatmul.bf16.gmra.mxu1 %v1871_v31  ;;  %1179 = vmatmul.bf16.gmra.mxu2 %v1875_v32  ;;  %v1955_v31 = vor.u32 %v2298_v25, %v1954_v24  ;;  %v2308_v25 = vld [vmem:[%s2904_s6 + $0x12c] sm:$0xf] }
  0xa0   : > { %1268 = vmatmul.bf16.gmra.mxu3 %v1879_v33  ;;  %v1959_v33 = vor.u32 %v2296_v26, %v1956_v27  ;;  %v2004_v26 = vld [vmem:[%s2904_s6 + $0x138] sm:$0xf0] }
  0xad   : > { %1095 = vmatmul.bf16.gmra.mxu1 %v1887_v40  ;;  %1184 = vmatmul.bf16.gmra.mxu2 %v1891_v41  ;;  %v1964_v40 = vld [vmem:[%s2904_s6 + $0xf0] sm:$0xf0]  ;;  %v1970_v41 = vld [vmem:[%s2904_s6 + $0xe8] sm:$0xf] }
  0xae   : > { %v1967_v47 = vor.u32 %v2299_v39, %v1964_v40  ;;  %v2007_v39 = vor.u32 %v2308_v25, %v2004_v26  ;;  %v2315_v26 = vld [vmem:[%s2904_s6 + $0x164] sm:$0xf] }
  0xb0   : > { %1273 = vmatmul.bf16.gmra.mxu3 %v1895_v42  ;;  %v2302_v42 = vld [vmem:[%s2904_s6 + $0xf4] sm:$0xf0] }
  0xb1   : > { %v1971_v48 = vor.u32 %v2302_v42, %v1970_v41 }
  0xbd   : > { %1100 = vmatmul.bf16.gmra.mxu1 %v1903_v49  ;;  %1189 = vmatmul.bf16.gmra.mxu2 %v1907_v50  ;;  %v1975_v50 = vor.u32 %v2300_v43, %v1972_v44 }
  0xc0   : > { %1278 = vmatmul.bf16.gmra.mxu3 %v1911_v51 }
  0xca   : > { %v2976_v62 = vpop.f32.mrf.mxu1 }
  0xcc   : > { %v997_v52 = vpop.f32.mrf.mxu0 }
  0xcd   : > { %1105 = vmatmul.bf16.gmra.mxu1 %v1919_v60  ;;  %1194 = vmatmul.bf16.gmra.mxu2 %v1923_v61  ;;  %v1988_v60 = vld [vmem:[%s2904_s6 + $0x118] sm:$0xf0] }
  0xce   : > { %v1991_v6 = vor.u32 %v2304_v59, %v1988_v60  ;;  %v2312_v60 = vld [vmem:[%s2904_s6 + $0x14c] sm:$0xf] }
  0xd0   : > { %1283 = vmatmul.bf16.gmra.mxu3 %v1927_v63  ;;  %v2978_v1 = vpop.f32.mrf.mxu2 }
  0xd2   : > { %v2982_v3 = vpop.f32.mrf.mxu1 }
  0xd3   : > { %v2980_v2 = vpop.f32.mrf.mxu3 }
  0xd4   : > { %v999_v7 = vpop.f32.mrf.mxu0 }
  0xd8   : > { %v2990_v11 = vpop.f32.mrf.mxu2 }
  0xda   : > { %v2994_v15 = vpop.f32.mrf.mxu1 }
  0xdb   : > { %v2992_v12 = vpop.f32.mrf.mxu3 }
  0xdd   : > { %1110 = vmatmul.bf16.gmra.mxu1 %v1935_v13  ;;  %1199 = vmatmul.bf16.gmra.mxu2 %v1939_v14  ;;  %v1002_v14 = vpop.f32.mrf.mxu0 }
  0xe0   : > { %1288 = vmatmul.bf16.gmra.mxu3 %v1943_v16  ;;  %v2996_v18 = vpop.f32.mrf.mxu2  ;;  %v2307_v16 = vld [vmem:[%s2904_s6 + $0x124] sm:$0xf] }
  0xe2   : > { %v3000_v20 = vpop.f32.mrf.mxu1 }
  0xe3   : > { %v2998_v19 = vpop.f32.mrf.mxu3 }
  0xe5   : > { %v1004_v43 = vpop.f32.mrf.mxu0 }
  0xe8   : > { %v3008_v28 = vpop.f32.mrf.mxu2 }
  0xea   : > { %v3012_v32 = vpop.f32.mrf.mxu1 }
  0xeb   : > { %v3010_v29 = vpop.f32.mrf.mxu3 }
  0xed   : > { %1115 = vmatmul.bf16.gmra.mxu1 %v1951_v30  ;;  %1204 = vmatmul.bf16.gmra.mxu2 %v1955_v31 }
  0xf0   : > { %1293 = vmatmul.bf16.gmra.mxu3 %v1959_v33  ;;  %v3014_v35 = vpop.f32.mrf.mxu2  ;;  %v1999_v33 = vor.u32 %v2307_v16, %v1996_v17 }
  0xf2   : > { %v3018_v37 = vpop.f32.mrf.mxu1 }
  0xf3   : > { %v3016_v36 = vpop.f32.mrf.mxu3 }
  0xf8   : > { %v3026_v45 = vpop.f32.mrf.mxu2 }
  0xfa   : > { %v3030_v49 = vpop.f32.mrf.mxu1 }
  0xfb   : > { %v3028_v46 = vpop.f32.mrf.mxu3 }
  0xfd   : > { %1120 = vmatmul.bf16.gmra.mxu1 %v1967_v47  ;;  %1209 = vmatmul.bf16.gmra.mxu2 %v1971_v48 }
 0x100   : > { %1298 = vmatmul.bf16.gmra.mxu3 %v1975_v50  ;;  %v3032_v51 = vpop.f32.mrf.mxu2 }
 0x102   : > { %v3036_v54 = vpop.f32.mrf.mxu1 }
 0x103   : > { %v3034_v53 = vpop.f32.mrf.mxu3 }
 0x108   : > { %v3044_v61 = vpop.f32.mrf.mxu2 }
 0x10a   : > { %v1086_v5 = vpop.f32.mrf.mxu1 }
 0x10b   : > { %v3046_v63 = vpop.f32.mrf.mxu3  ;;  %v1087_v13 = vadd.f32 %v1086_v5, %v997_v52  ;;  %v2311_v52 = vld [vmem:[%s2904_s6 + $0x144] sm:$0xf] }
 0x10d   : > { %1125 = vmatmul.bf16.gmra.mxu1 %v1983_v0  ;;  %1214 = vmatmul.bf16.gmra.mxu2 %v1987_v4  ;;  %v2020_v0 = vld [vmem:[%s2904_s6 + $0x158] sm:$0xf0]  ;;  %v1007_v4 = vpop.f32.mrf.mxu0 }
 0x110   : > { %1303 = vmatmul.bf16.gmra.mxu3 %v1991_v6  ;;  %v1175_v8 = vpop.f32.mrf.mxu2 }
 0x111   : > { %v1176_v23 = vadd.f32 %v1175_v8, %v1087_v13  ;;  %v2015_v8 = vor.u32 %v2311_v52, %v2012_v55  ;;  %v2023_v13 = vor.u32 %v2312_v60, %v2020_v0  ;;  %v2319_v0 = vld [vmem:[%s2904_s6 + $0x184] sm:$0xf] }
 0x112   : > { %v1088_v10 = vpop.f32.mrf.mxu1 }
 0x113   : > { %v1264_v9 = vpop.f32.mrf.mxu3  ;;  %v1089_v24 = vadd.f32 %v1088_v10, %v999_v7 }
 0x114   : > { %v1265_v40 = vadd.f32 %v1264_v9, %v1176_v23  ;;  %v2019_v9 = vor.u32 %v2314_v57, %v2018_v56 }
 0x115   : > { %v1009_v23 = vpop.f32.mrf.mxu0 }
 0x118   : > { %v1177_v27 = vpop.f32.mrf.mxu2 }
 0x119   : > { %v1178_v30 = vadd.f32 %v1177_v27, %v1089_v24  ;;  %v2028_v27 = vld [vmem:[%s2904_s6 + $0x170] sm:$0xf0] }
 0x11a   : > { %v1091_v38 = vpop.f32.mrf.mxu1 }
 0x11b   : > { %v1266_v31 = vpop.f32.mrf.mxu3  ;;  %v1092_v50 = vadd.f32 %v1091_v38, %v1002_v14  ;;  %v2316_v38 = vld [vmem:[%s2904_s6 + $0x16c] sm:$0xf] }
 0x11c   : > { %v1267_v41 = vadd.f32 %v1266_v31, %v1178_v30  ;;  %v2034_v30 = vld [vmem:[%s2904_s6 + $0x168] sm:$0xf]  ;;  %v2318_v31 = vld [vmem:[%s2904_s6 + $0x174] sm:$0xf0] }
 0x11d   : > { %1130 = vmatmul.bf16.gmra.mxu1 %v1999_v33  ;;  %1219 = vmatmul.bf16.gmra.mxu2 %v2003_v34  ;;  %v1012_v55 = vpop.f32.mrf.mxu0 }
 0x11e   : > { %v1443_v42 = vpack.c.bf16 %v1267_v41, %v1265_v40 }
 0x120   : > { %1308 = vmatmul.bf16.gmra.mxu3 %v2007_v39  ;;  %1535 = vmatmul.bf16.vlgmr.msrb.gmra.mxu0 %v1443_v42  ;;  %v1180_v44 = vpop.f32.mrf.mxu2  ;;  %v2036_v39 = vld [vmem:[%s2904_s6 + $0x178] sm:$0xf0] }
 0x121   : > { %v1181_v58 = vadd.f32 %v1180_v44, %v1092_v50  ;;  %v2035_v44 = vor.u32 %v2318_v31, %v2034_v30 }
 0x122   : > { %v1093_v48 = vpop.f32.mrf.mxu1 }
 0x123   : > { %v1269_v47 = vpop.f32.mrf.mxu3  ;;  %v1094_v59 = vadd.f32 %v1093_v48, %v1004_v43  ;;  %v2031_v43 = vor.u32 %v2315_v26, %v2028_v27  ;;  %v2039_v48 = vor.u32 %v2316_v38, %v2036_v39  ;;  %v2323_v38 = vld [vmem:[%s2904_s6 + $0x1a4] sm:$0xf]  ;;  %v2060_v39 = vld [vmem:[%s2904_s6 + $0x1b0] sm:$0xf0] }
 0x124   : > { %v1270_v14 = vadd.f32 %v1269_v47, %v1181_v58 }
 0x128   : > { %v1182_v5 = vpop.f32.mrf.mxu2 }
 0x129   : > { %v1183_v6 = vadd.f32 %v1182_v5, %v1094_v59  ;;  %v2044_v5 = vld [vmem:[%s2904_s6 + $0x190] sm:$0xf0] }
 0x12a   : > { %v1096_v10 = vpop.f32.mrf.mxu1 }
 0x12b   : > { %v1271_v7 = vpop.f32.mrf.mxu3  ;;  %v1097_v25 = vadd.f32 %v1096_v10, %v1007_v4  ;;  %v1014_v4 = vpop.f32.mrf.mxu0  ;;  %v2320_v10 = vld [vmem:[%s2904_s6 + $0x18c] sm:$0xf] }
 0x12c   : > { %v1272_v16 = vadd.f32 %v1271_v7, %v1183_v6  ;;  %v2050_v6 = vld [vmem:[%s2904_s6 + $0x188] sm:$0xf]  ;;  %v2322_v7 = vld [vmem:[%s2904_s6 + $0x194] sm:$0xf0] }
 0x12d   : > { %1135 = vmatmul.bf16.gmra.mxu1 %v2015_v8  ;;  %1224 = vmatmul.bf16.gmra.mxu2 %v2019_v9 }
 0x12e   : > { %v1444_v17 = vpack.c.bf16 %v1272_v16, %v1270_v14 }
 0x130   : > { %1313 = vmatmul.bf16.gmra.mxu3 %v2023_v13  ;;  %1540 = vmatmul.bf16.gmra.mxu0 %v1444_v17  ;;  %v1185_v21 = vpop.f32.mrf.mxu2  ;;  %v2052_v13 = vld [vmem:[%s2904_s6 + $0x198] sm:$0xf0] }
 0x131   : > { %v1186_v33 = vadd.f32 %v1185_v21, %v1097_v25  ;;  %v2047_v21 = vor.u32 %v2319_v0, %v2044_v5 }
 0x132   : > { %v1098_v24 = vpop.f32.mrf.mxu1 }
 0x133   : > { %v1274_v22 = vpop.f32.mrf.mxu3  ;;  %v1099_v34 = vadd.f32 %v1098_v24, %v1009_v23  ;;  %v2055_v24 = vor.u32 %v2320_v10, %v2052_v13 }
 0x134   : > { %v1275_v50 = vadd.f32 %v1274_v22, %v1186_v33  ;;  %v2051_v22 = vor.u32 %v2322_v7, %v2050_v6  ;;  %v2327_v6 = vld [vmem:[%s2904_s6 + $0x1c4] sm:$0xf]  ;;  %v2076_v7 = vld [vmem:[%s2904_s6 + $0x1d0] sm:$0xf0] }
 0x138   : > { %v1187_v40 = vpop.f32.mrf.mxu2 }
 0x139   : > { %v1188_v41 = vadd.f32 %v1187_v40, %v1099_v34  ;;  %v2066_v40 = vld [vmem:[%s2904_s6 + $0x1a8] sm:$0xf] }
 0x13a   : > { %v1101_v47 = vpop.f32.mrf.mxu1 }
 0x13b   : > { %v1276_v42 = vpop.f32.mrf.mxu3  ;;  %v1102_v60 = vadd.f32 %v1101_v47, %v1012_v55  ;;  %v2068_v47 = vld [vmem:[%s2904_s6 + $0x1b8] sm:$0xf0]  ;;  %v2063_v55 = vor.u32 %v2323_v38, %v2060_v39  ;;  %v2331_v38 = vld [vmem:[%s2904_s6 + $0x1e4] sm:$0xf]  ;;  %v2092_v39 = vld [vmem:[%s2904_s6 + $0x1f0] sm:$0xf0] }
 0x13c   : > { %v1277_v52 = vadd.f32 %v1276_v42, %v1188_v41  ;;  %v2326_v41 = vld [vmem:[%s2904_s6 + $0x1b4] sm:$0xf0] }
 0x13d   : > { %1140 = vmatmul.bf16.gmra.mxu1 %v2031_v43  ;;  %1229 = vmatmul.bf16.gmra.mxu2 %v2035_v44  ;;  %v2324_v44 = vld [vmem:[%s2904_s6 + $0x1ac] sm:$0xf] }
 0x13e   : > { %v1445_v56 = vpack.c.bf16 %v1277_v52, %v1275_v50 }
 0x140   : > { %1318 = vmatmul.bf16.gmra.mxu3 %v2039_v48  ;;  %1545 = vmatmul.bf16.gmra.mxu0 %v1445_v56  ;;  %v1190_v57 = vpop.f32.mrf.mxu2  ;;  %v2067_v56 = vor.u32 %v2326_v41, %v2066_v40  ;;  %v2098_v40 = vld [vmem:[%s2904_s6 + $0x1e8] sm:$0xf]  ;;  %v2334_v41 = vld [vmem:[%s2904_s6 + $0x1f4] sm:$0xf0] }
 0x141   : > { %v1191_v8 = vadd.f32 %v1190_v57, %v1102_v60 }
 0x142   : > { %v1103_v59 = vpop.f32.mrf.mxu1 }
 0x143   : > { %v1279_v58 = vpop.f32.mrf.mxu3  ;;  %v1104_v9 = vadd.f32 %v1103_v59, %v1014_v4 }
 0x144   : > { %v1280_v25 = vadd.f32 %v1279_v58, %v1191_v8  ;;  %v2082_v8 = vld [vmem:[%s2904_s6 + $0x1c8] sm:$0xf] }
 0x148   : > { %v1192_v14 = vpop.f32.mrf.mxu2 }
 0x149   : > { %v1193_v16 = vadd.f32 %v1192_v14, %v1104_v9  ;;  %v2330_v9 = vld [vmem:[%s2904_s6 + $0x1d4] sm:$0xf0]  ;;  %v2328_v14 = vld [vmem:[%s2904_s6 + $0x1cc] sm:$0xf] }
 0x14a   : > { %v1106_v23 = vpop.f32.mrf.mxu1 }
 0x14b   : > { %v1281_v17 = vpop.f32.mrf.mxu3  ;;  %v1107_v34 = vadd.f32 %v1106_v23, %v2976_v62  ;;  %v2071_v62 = vor.u32 %v2324_v44, %v2068_v47  ;;  %v2079_v23 = vor.u32 %v2327_v6, %v2076_v7  ;;  %v2332_v44 = vld [vmem:[%s2904_s6 + $0x1ec] sm:$0xf]  ;;  %v2100_v47 = vld [vmem:[%s2904_s6 + $0x1f8] sm:$0xf0] }
 0x14c   : > { %v1282_v26 = vadd.f32 %v1281_v17, %v1193_v16  ;;  %v2084_v16 = vld [vmem:[%s2904_s6 + $0x1d8] sm:$0xf0] }
 0x14d   : > { %1145 = vmatmul.bf16.gmra.mxu1 %v2047_v21  ;;  %1234 = vmatmul.bf16.gmra.mxu2 %v2051_v22 }
 0x14e   : > { %v1446_v27 = vpack.c.bf16 %v1282_v26, %v1280_v25 }
 0x150   : > { %1323 = vmatmul.bf16.gmra.mxu3 %v2055_v24  ;;  %1550 = vmatmul.bf16.gmra.mxu0 %v1446_v27  ;;  %v1195_v30 = vpop.f32.mrf.mxu2  ;;  %v2083_v24 = vor.u32 %v2330_v9, %v2082_v8 }
 0x151   : > { %v1196_v42 = vadd.f32 %v1195_v30, %v1107_v34 }
 0x152   : > { %v1108_v33 = vpop.f32.mrf.mxu1 }
 0x153   : > { %v1284_v31 = vpop.f32.mrf.mxu3  ;;  %v1109_v43 = vadd.f32 %v1108_v33, %v2982_v3 }
 0x154   : > { %v1285_v58 = vadd.f32 %v1284_v31, %v1196_v42 }
 0x158   : > { %v1197_v48 = vpop.f32.mrf.mxu2 }
 0x159   : > { %v1198_v50 = vadd.f32 %v1197_v48, %v1109_v43 }
 0x15a   : > { %v1111_v57 = vpop.f32.mrf.mxu1 }
 0x15b   : > { %v1286_v52 = vpop.f32.mrf.mxu3  ;;  %v1112_v5 = vadd.f32 %v1111_v57, %v2994_v15  ;;  %v2087_v15 = vor.u32 %v2328_v14, %v2084_v16 }
 0x15c   : > { %v1287_v59 = vadd.f32 %v1286_v52, %v1198_v50 }
 0x15d   : > { %1150 = vmatmul.bf16.gmra.mxu1 %v2063_v55  ;;  %1239 = vmatmul.bf16.gmra.mxu2 %v2067_v56  ;;  %v2095_v55 = vor.u32 %v2331_v38, %v2092_v39  ;;  %v2099_v56 = vor.u32 %v2334_v41, %v2098_v40 }
 0x15e   : > { %v1447_v3 = vpack.c.bf16 %v1287_v59, %v1285_v58 }
 0x160   : > { %1328 = vmatmul.bf16.gmra.mxu3 %v2071_v62  ;;  %1555 = vmatmul.bf16.gmra.mxu0 %v1447_v3  ;;  %v1200_v60 = vpop.f32.mrf.mxu2  ;;  %v2103_v62 = vor.u32 %v2332_v44, %v2100_v47 }
 0x161   : > { %v1201_v10 = vadd.f32 %v1200_v60, %v1112_v5 }
 0x162   : > { %v1113_v4 = vpop.f32.mrf.mxu1 }
 0x163   : > { %v1289_v0 = vpop.f32.mrf.mxu3  ;;  %v1114_v13 = vadd.f32 %v1113_v4, %v3000_v20 }
 0x164   : > { %v1290_v26 = vadd.f32 %v1289_v0, %v1201_v10 }
 0x168   : > { %v1202_v17 = vpop.f32.mrf.mxu2 }
 0x169   : > { %v1203_v21 = vadd.f32 %v1202_v17, %v1114_v13 }
 0x16a   : > { %v1116_v25 = vpop.f32.mrf.mxu1 }
 0x16b   : > { %v1291_v22 = vpop.f32.mrf.mxu3  ;;  %v1117_v34 = vadd.f32 %v1116_v25, %v3012_v32 }
 0x16c   : > { %v1292_v27 = vadd.f32 %v1291_v22, %v1203_v21 }
 0x16d   : > { %1155 = vmatmul.bf16.gmra.mxu1 %v2079_v23  ;;  %1244 = vmatmul.bf16.gmra.mxu2 %v2083_v24 }
 0x16e   : > { %v1448_v20 = vpack.c.bf16 %v1292_v27, %v1290_v26 }
 0x170   : > { %1333 = vmatmul.bf16.gmra.mxu3 %v2087_v15  ;;  %1560 = vmatmul.bf16.gmra.mxu0 %v1448_v20  ;;  %v1205_v30 = vpop.f32.mrf.mxu2 }
 0x171   : > { %v1206_v42 = vadd.f32 %v1205_v30, %v1117_v34 }
 0x172   : > { %v1118_v33 = vpop.f32.mrf.mxu1 }
 0x173   : > { %v1294_v31 = vpop.f32.mrf.mxu3  ;;  %v1119_v43 = vadd.f32 %v1118_v33, %v3018_v37 }
 0x174   : > { %v1295_v58 = vadd.f32 %v1294_v31, %v1206_v42  ;;  %v3103_v31 = vld [vmem:[%s3212_s3] ss:$0 sm:$0xff] }
 0x178   : > { %v1207_v48 = vpop.f32.mrf.mxu2 }
 0x179   : > { %v1208_v50 = vadd.f32 %v1207_v48, %v1119_v43 }
 0x17a   : > { %v1121_v57 = vpop.f32.mrf.mxu1 }
 0x17b   : > { %v1296_v52 = vpop.f32.mrf.mxu3  ;;  %v1122_v37 = vadd.f32 %v1121_v57, %v3030_v49 }
 0x17c   : > { %v1297_v59 = vadd.f32 %v1296_v52, %v1208_v50 }
 0x17d   : > { %1160 = vmatmul.bf16.gmra.mxu1 %v2095_v55  ;;  %1249 = vmatmul.bf16.gmra.mxu2 %v2099_v56 }
 0x17e   : > { %v1449_v32 = vpack.c.bf16 %v1297_v59, %v1295_v58 }
 0x180   : > { %1338 = vmatmul.bf16.gmra.mxu3 %v2103_v62  ;;  %1565 = vmatmul.bf16.gmra.mxu0 %v1449_v32  ;;  %v1210_v3 = vpop.f32.mrf.mxu2 }
 0x181   : > { %v1211_v4 = vadd.f32 %v1210_v3, %v1122_v37 }
 0x182   : > { %v1123_v0 = vpop.f32.mrf.mxu1 }
 0x183   : > { %v1299_v60 = vpop.f32.mrf.mxu3  ;;  %v1124_v5 = vadd.f32 %v1123_v0, %v3036_v54 }
 0x184   : > { %v1300_v10 = vadd.f32 %v1299_v60, %v1211_v4 }
 0x188   : > { %v1212_v6 = vpop.f32.mrf.mxu2 }
 0x189   : > { %v1213_v7 = vadd.f32 %v1212_v6, %v1124_v5 }
 0x18a   : > { %v1126_v9 = vpop.f32.mrf.mxu1 }
 0x18b   : > { %v1301_v8 = vpop.f32.mrf.mxu3  ;;  %v1127_v22 = vadd.f32 %v1126_v9, %v2978_v1 }
 0x18c   : > { %v1302_v13 = vadd.f32 %v1301_v8, %v1213_v7 }
 0x18e   : > { %v1450_v14 = vpack.c.bf16 %v1302_v13, %v1300_v10 }
 0x190   : > { %1570 = vmatmul.bf16.gmra.mxu0 %v1450_v14  ;;  %v1215_v16 = vpop.f32.mrf.mxu2 }
 0x191   : > { %v1216_v23 = vadd.f32 %v1215_v16, %v1127_v22 }
 0x192   : > { %v1128_v21 = vpop.f32.mrf.mxu1 }
 0x193   : > { %v1304_v17 = vpop.f32.mrf.mxu3  ;;  %v1129_v24 = vadd.f32 %v1128_v21, %v2990_v11 }
 0x194   : > { %v1305_v26 = vadd.f32 %v1304_v17, %v1216_v23 }
 0x198   : > { %v1217_v49 = vpop.f32.mrf.mxu2 }
 0x199   : > { %v1218_v25 = vadd.f32 %v1217_v49, %v1129_v24 }
 0x19a   : > { %v1131_v15 = vpop.f32.mrf.mxu1 }
 0x19b   : > { %v1306_v54 = vpop.f32.mrf.mxu3  ;;  %v1132_v39 = vadd.f32 %v1131_v15, %v2996_v18 }
 0x19c   : > { %v1307_v27 = vadd.f32 %v1306_v54, %v1218_v25 }
 0x19d   : > { %v1536_v20 = vpop.f32.mrf.mxu0 }
 0x19e   : > { %v1451_v30 = vpack.c.bf16 %v1307_v27, %v1305_v26  ;;  %v1537_v11 = vadd.f32 %v3103_v31, %v1536_v20 }
 0x1a0   : > { %1575 = vmatmul.bf16.gmra.mxu0 %v1451_v30  ;;  %v1220_v33 = vpop.f32.mrf.mxu2  ;;  %v1616_v41 = vmax.f32 %v1537_v11, 0.0 }
 0x1a1   : > { %v1221_v42 = vadd.f32 %v1220_v33, %v1132_v39 }
 0x1a2   : > { %v1133_v34 = vpop.f32.mrf.mxu1 }
 0x1a3   : > { %v1309_v1 = vpop.f32.mrf.mxu3  ;;  %v1134_v43 = vadd.f32 %v1133_v34, %v3008_v28 }
 0x1a4   : > { %v1310_v56 = vadd.f32 %v1309_v1, %v1221_v42 }
 0x1a5   : > { %v1538_v38 = vpop.f32.mrf.mxu0 }
 0x1a6   : > { %v1539_v40 = vadd.f32 %v3103_v31, %v1538_v38 }
 0x1a8   : > { %v1617_v44 = vmax.f32 %v1539_v40, 0.0  ;;  %v1222_v47 = vpop.f32.mrf.mxu2 }
 0x1a9   : > { %v1223_v50 = vadd.f32 %v1222_v47, %v1134_v43 }
 0x1aa   : > { %v2379_v48 = vpack.c.bf16 %v1617_v44, %v1616_v41  ;;  %v1136_v55 = vpop.f32.mrf.mxu1 }
 0x1ab   : > { %v1311_v52 = vpop.f32.mrf.mxu3  ;;  %v1137_v60 = vadd.f32 %v1136_v55, %v3014_v35 }
 0x1ac   : > { %2380 = vst [vmem:[%s3110_s25] sm:$0xff] %v2379_v48   ;;  %v1312_v57 = vadd.f32 %v1311_v52, %v1223_v50 }
 0x1ad   : > { %v1541_v18 = vpop.f32.mrf.mxu0 }
 0x1ae   : > { %v1452_v62 = vpack.c.bf16 %v1312_v57, %v1310_v56  ;;  %v1542_v28 = vadd.f32 %v3103_v31, %v1541_v18 }
 0x1b0   : > { %1580 = vmatmul.bf16.gmra.mxu0 %v1452_v62  ;;  %v1225_v58 = vpop.f32.mrf.mxu2  ;;  %v1618_v37 = vmax.f32 %v1542_v28, 0.0 }
 0x1b1   : > { %v1226_v4 = vadd.f32 %v1225_v58, %v1137_v60 }
 0x1b2   : > { %v1138_v32 = vpop.f32.mrf.mxu1 }
 0x1b3   : > { %v1314_v59 = vpop.f32.mrf.mxu3  ;;  %v1139_v5 = vadd.f32 %v1138_v32, %v3026_v45 }
 0x1b4   : > { %v1315_v14 = vadd.f32 %v1314_v59, %v1226_v4 }
 0x1b5   : > { %v1543_v3 = vpop.f32.mrf.mxu0 }
 0x1b6   : > { %v1544_v0 = vadd.f32 %v3103_v31, %v1543_v3 }
 0x1b8   : > { %v1619_v6 = vmax.f32 %v1544_v0, 0.0  ;;  %v1227_v7 = vpop.f32.mrf.mxu2 }
 0x1b9   : > { %v1228_v9 = vadd.f32 %v1227_v7, %v1139_v5 }
 0x1ba   : > { %v2384_v8 = vpack.c.bf16 %v1619_v6, %v1618_v37  ;;  %v1141_v13 = vpop.f32.mrf.mxu1 }
 0x1bb   : > { %v1316_v10 = vpop.f32.mrf.mxu3  ;;  %v1142_v45 = vadd.f32 %v1141_v13, %v3032_v51 }
 0x1bc   : > { %2456 = vst [vmem:[%s3110_s25 + $0x8] sm:$0xff] %v2384_v8   ;;  %v1317_v16 = vadd.f32 %v1316_v10, %v1228_v9 }
 0x1bd   : > { %v1546_v17 = vpop.f32.mrf.mxu0 }
 0x1be   : > { %v1453_v21 = vpack.c.bf16 %v1317_v16, %v1315_v14  ;;  %v1547_v24 = vadd.f32 %v3103_v31, %v1546_v17 }
 0x1c0   : > { %1585 = vmatmul.bf16.gmra.mxu0 %v1453_v21  ;;  %v1230_v22 = vpop.f32.mrf.mxu2  ;;  %v1620_v54 = vmax.f32 %v1547_v24, 0.0 }
 0x1c1   : > { %v1231_v15 = vadd.f32 %v1230_v22, %v1142_v45 }
 0x1c2   : > { %v1143_v23 = vpop.f32.mrf.mxu1 }
 0x1c3   : > { %v1319_v35 = vpop.f32.mrf.mxu3  ;;  %v1144_v26 = vadd.f32 %v1143_v23, %v3044_v61 }
 0x1c4   : > { %v1320_v11 = vadd.f32 %v1319_v35, %v1231_v15 }
 0x1c5   : > { %v1548_v49 = vpop.f32.mrf.mxu0 }
 0x1c6   : > { %v1549_v25 = vadd.f32 %v3103_v31, %v1548_v49 }
 0x1c8   : > { %v1621_v27 = vmax.f32 %v1549_v25, 0.0  ;;  %v1232_v20 = vpop.f32.mrf.mxu2 }
 0x1c9   : > { %v1233_v33 = vadd.f32 %v1232_v20, %v1144_v26 }
 0x1ca   : > { %v2389_v30 = vpack.c.bf16 %v1621_v27, %v1620_v54  ;;  %v1146_v34 = vpop.f32.mrf.mxu1 }
 0x1cb   : > { %v1321_v1 = vpop.f32.mrf.mxu3  ;;  %v1147_v61 = vadd.f32 %v1146_v34, %v2980_v2 }
 0x1cc   : > { %2457 = vst [vmem:[%s3110_s25 + $0x10] sm:$0xff] %v2389_v30   ;;  %v1322_v38 = vadd.f32 %v1321_v1, %v1233_v33 }
 0x1cd   : > { %v1551_v39 = vpop.f32.mrf.mxu0 }
 0x1ce   : > { %v1454_v40 = vpack.c.bf16 %v1322_v38, %v1320_v11  ;;  %v1552_v43 = vadd.f32 %v3103_v31, %v1551_v39 }
 0x1d0   : > { %1590 = vmatmul.bf16.gmra.mxu0 %v1454_v40  ;;  %v1235_v41 = vpop.f32.mrf.mxu2  ;;  %v1622_v48 = vmax.f32 %v1552_v43, 0.0 }
 0x1d1   : > { %v1236_v50 = vadd.f32 %v1235_v41, %v1147_v61 }
 0x1d2   : > { %v1148_v42 = vpop.f32.mrf.mxu1 }
 0x1d3   : > { %v1324_v51 = vpop.f32.mrf.mxu3  ;;  %v1149_v52 = vadd.f32 %v1148_v42, %v2992_v12 }
 0x1d4   : > { %v1325_v59 = vadd.f32 %v1324_v51, %v1236_v50 }
 0x1d5   : > { %v1553_v44 = vpop.f32.mrf.mxu0 }
 0x1d6   : > { %v1554_v47 = vadd.f32 %v3103_v31, %v1553_v44 }
 0x1d8   : > { %v1623_v55 = vmax.f32 %v1554_v47, 0.0  ;;  %v1237_v56 = vpop.f32.mrf.mxu2 }
 0x1d9   : > { %v1238_v18 = vadd.f32 %v1237_v56, %v1149_v52 }
 0x1da   : > { %v2394_v57 = vpack.c.bf16 %v1623_v55, %v1622_v48  ;;  %v1151_v58 = vpop.f32.mrf.mxu1 }
 0x1db   : > { %v1326_v62 = vpop.f32.mrf.mxu3  ;;  %v1152_v12 = vadd.f32 %v1151_v58, %v2998_v19 }
 0x1dc   : > { %2458 = vst [vmem:[%s3110_s25 + $0x18] sm:$0xff] %v2394_v57   ;;  %v1327_v32 = vadd.f32 %v1326_v62, %v1238_v18 }
 0x1dd   : > { %v1556_v28 = vpop.f32.mrf.mxu0 }
 0x1de   : > { %v1455_v3 = vpack.c.bf16 %v1327_v32, %v1325_v59  ;;  %v1557_v37 = vadd.f32 %v3103_v31, %v1556_v28 }
 0x1e0   : > { %1595 = vmatmul.bf16.gmra.mxu0 %v1455_v3  ;;  %v1240_v60 = vpop.f32.mrf.mxu2  ;;  %v1624_v6 = vmax.f32 %v1557_v37, 0.0 }
 0x1e1   : > { %v1241_v7 = vadd.f32 %v1240_v60, %v1152_v12 }
 0x1e2   : > { %v1153_v0 = vpop.f32.mrf.mxu1 }
 0x1e3   : > { %v1329_v2 = vpop.f32.mrf.mxu3  ;;  %v1154_v8 = vadd.f32 %v1153_v0, %v3010_v29 }
 0x1e4   : > { %v1330_v21 = vadd.f32 %v1329_v2, %v1241_v7 }
 0x1e5   : > { %v1558_v4 = vpop.f32.mrf.mxu0 }
 0x1e6   : > { %v1559_v5 = vadd.f32 %v3103_v31, %v1558_v4 }
 0x1e8   : > { %v1625_v9 = vmax.f32 %v1559_v5, 0.0  ;;  %v1242_v10 = vpop.f32.mrf.mxu2 }
 0x1e9   : > { %v1243_v14 = vadd.f32 %v1242_v10, %v1154_v8 }
 0x1ea   : > { %v2399_v13 = vpack.c.bf16 %v1625_v9, %v1624_v6  ;;  %v1156_v17 = vpop.f32.mrf.mxu1 }
 0x1eb   : > { %v1331_v16 = vpop.f32.mrf.mxu3  ;;  %v1157_v29 = vadd.f32 %v1156_v17, %v3016_v36 }
 0x1ec   : > { %2459 = vst [vmem:[%s3110_s25 + $0x20] sm:$0xff] %v2399_v13   ;;  %v1332_v22 = vadd.f32 %v1331_v16, %v1243_v14 }
 0x1ed   : > { %v1561_v35 = vpop.f32.mrf.mxu0 }
 0x1ee   : > { %v1456_v23 = vpack.c.bf16 %v1332_v22, %v1330_v21  ;;  %v1562_v45 = vadd.f32 %v3103_v31, %v1561_v35 }
 0x1f0   : > { %1600 = vmatmul.bf16.gmra.mxu0 %v1456_v23  ;;  %v1245_v24 = vpop.f32.mrf.mxu2  ;;  %v1626_v15 = vmax.f32 %v1562_v45, 0.0 }
 0x1f1   : > { %v1246_v26 = vadd.f32 %v1245_v24, %v1157_v29 }
 0x1f2   : > { %v1158_v49 = vpop.f32.mrf.mxu1 }
 0x1f3   : > { %v1334_v19 = vpop.f32.mrf.mxu3  ;;  %v1159_v27 = vadd.f32 %v1158_v49, %v3028_v46 }
 0x1f4   : > { %v1335_v38 = vadd.f32 %v1334_v19, %v1246_v26 }
 0x1f5   : > { %v1563_v25 = vpop.f32.mrf.mxu0 }
 0x1f6   : > { %v1564_v54 = vadd.f32 %v3103_v31, %v1563_v25 }
 0x1f8   : > { %v1627_v20 = vmax.f32 %v1564_v54, 0.0  ;;  %v1247_v30 = vpop.f32.mrf.mxu2 }
 0x1f9   : > { %v1248_v1 = vadd.f32 %v1247_v30, %v1159_v27 }
 0x1fa   : > { %v2404_v33 = vpack.c.bf16 %v1627_v20, %v1626_v15  ;;  %v1161_v11 = vpop.f32.mrf.mxu1 }
 0x1fb   : > { %v1336_v34 = vpop.f32.mrf.mxu3  ;;  %v1162_v46 = vadd.f32 %v1161_v11, %v3034_v53 }
 0x1fc   : > { %2460 = vst [vmem:[%s3110_s25 + $0x28] sm:$0xff] %v2404_v33   ;;  %v1337_v39 = vadd.f32 %v1336_v34, %v1248_v1 }
 0x1fd   : > { %v1566_v40 = vpop.f32.mrf.mxu0 }
 0x1fe   : > { %v1457_v41 = vpack.c.bf16 %v1337_v39, %v1335_v38  ;;  %v1567_v42 = vadd.f32 %v3103_v31, %v1566_v40 }
 0x200   : > { %1605 = vmatmul.bf16.gmra.mxu0 %v1457_v41  ;;  %v1250_v51 = vpop.f32.mrf.mxu2  ;;  %v1628_v47 = vmax.f32 %v1567_v42, 0.0 }
 0x201   : > { %v1251_v48 = vadd.f32 %v1250_v51, %v1162_v46 }
 0x202   : > { %v1163_v43 = vpop.f32.mrf.mxu1 }
 0x203   : > { %v1339_v36 = vpop.f32.mrf.mxu3  ;;  %v1164_v50 = vadd.f32 %v1163_v43, %v3046_v63 }
 0x204   : > { %v1340_v62 = vadd.f32 %v1339_v36, %v1251_v48 }
 0x205   : > { %v1568_v44 = vpop.f32.mrf.mxu0 }
 0x206   : > { %v1569_v61 = vadd.f32 %v3103_v31, %v1568_v44 }
 0x208   : > { %v1629_v52 = vmax.f32 %v1569_v61, 0.0  ;;  %v1252_v55 = vpop.f32.mrf.mxu2 }
 0x209   : > { %v1253_v57 = vadd.f32 %v1252_v55, %v1164_v50 }
 0x20a   : > { %v2409_v56 = vpack.c.bf16 %v1629_v52, %v1628_v47 }
 0x20b   : > { %v1341_v18 = vpop.f32.mrf.mxu3 }
 0x20c   : > { %2461 = vst [vmem:[%s3110_s25 + $0x30] sm:$0xff] %v2409_v56   ;;  %v1342_v58 = vadd.f32 %v1341_v18, %v1253_v57 }
 0x20d   : > { %v1571_v59 = vpop.f32.mrf.mxu0 }
 0x20e   : > { %v1458_v32 = vpack.c.bf16 %v1342_v58, %v1340_v62  ;;  %v1572_v53 = vadd.f32 %v3103_v31, %v1571_v59 }
 0x210   : > { %1610 = vmatmul.bf16.gmra.mxu0 %v1458_v32  ;;  %v1630_v60 = vmax.f32 %v1572_v53, 0.0 }
 0x215   : > { %v1573_v28 = vpop.f32.mrf.mxu0 }
 0x216   : > { %v1574_v3 = vadd.f32 %v3103_v31, %v1573_v28 }
 0x218   : > { %v1631_v63 = vmax.f32 %v1574_v3, 0.0 }
 0x21a   : > { %v2414_v2 = vpack.c.bf16 %v1631_v63, %v1630_v60 }
 0x21c   : > { %2462 = vst [vmem:[%s3110_s25 + $0x38] sm:$0xff] %v2414_v2  }
 0x21d   : > { %v1576_v0 = vpop.f32.mrf.mxu0 }
 0x21e   : > { %v1577_v37 = vadd.f32 %v3103_v31, %v1576_v0 }
 0x220   : > { %v1632_v5 = vmax.f32 %v1577_v37, 0.0 }
 0x225   : > { %v1578_v4 = vpop.f32.mrf.mxu0 }
 0x226   : > { %v1579_v12 = vadd.f32 %v3103_v31, %v1578_v4 }
 0x228   : > { %v1633_v6 = vmax.f32 %v1579_v12, 0.0 }
 0x22a   : > { %v2419_v7 = vpack.c.bf16 %v1633_v6, %v1632_v5 }
 0x22c   : > { %2463 = vst [vmem:[%s3110_s25 + $0x40] sm:$0xff] %v2419_v7  }
 0x22d   : > { %v1581_v8 = vpop.f32.mrf.mxu0 }
 0x22e   : > { %v1582_v9 = vadd.f32 %v3103_v31, %v1581_v8 }
 0x230   : > { %v1634_v14 = vmax.f32 %v1582_v9, 0.0 }
 0x235   : > { %v1583_v10 = vpop.f32.mrf.mxu0 }
 0x236   : > { %v1584_v13 = vadd.f32 %v3103_v31, %v1583_v10 }
 0x238   : > { %v1635_v16 = vmax.f32 %v1584_v13, 0.0 }
 0x23a   : > { %v2424_v17 = vpack.c.bf16 %v1635_v16, %v1634_v14 }
 0x23c   : > { %2464 = vst [vmem:[%s3110_s25 + $0x48] sm:$0xff] %v2424_v17  }
 0x23d   : > { %v1586_v21 = vpop.f32.mrf.mxu0 }
 0x23e   : > { %v1587_v22 = vadd.f32 %v3103_v31, %v1586_v21 }
 0x240   : > { %v1636_v24 = vmax.f32 %v1587_v22, 0.0 }
 0x245   : > { %v1588_v35 = vpop.f32.mrf.mxu0 }
 0x246   : > { %v1589_v23 = vadd.f32 %v3103_v31, %v1588_v35 }
 0x248   : > { %v1637_v19 = vmax.f32 %v1589_v23, 0.0 }
 0x24a   : > { %v2429_v49 = vpack.c.bf16 %v1637_v19, %v1636_v24 }
 0x24c   : > { %2465 = vst [vmem:[%s3110_s25 + $0x50] sm:$0xff] %v2429_v49  }
 0x24d   : > { %v1591_v45 = vpop.f32.mrf.mxu0 }
 0x24e   : > { %v1592_v25 = vadd.f32 %v3103_v31, %v1591_v45 }
 0x250   : > { %v1638_v15 = vmax.f32 %v1592_v25, 0.0 }
 0x255   : > { %v1593_v29 = vpop.f32.mrf.mxu0 }
 0x256   : > { %v1594_v54 = vadd.f32 %v3103_v31, %v1593_v29 }
 0x258   : > { %v1639_v26 = vmax.f32 %v1594_v54, 0.0 }
 0x25a   : > { %v2434_v27 = vpack.c.bf16 %v1639_v26, %v1638_v15 }
 0x25c   : > { %2466 = vst [vmem:[%s3110_s25 + $0x58] sm:$0xff] %v2434_v27  }
 0x25d   : > { %v1596_v20 = vpop.f32.mrf.mxu0 }
 0x25e   : > { %v1597_v30 = vadd.f32 %v3103_v31, %v1596_v20 }
 0x260   : > { %v1640_v34 = vmax.f32 %v1597_v30, 0.0 }
 0x265   : > { %v1598_v33 = vpop.f32.mrf.mxu0 }
 0x266   : > { %v1599_v1 = vadd.f32 %v3103_v31, %v1598_v33 }
 0x268   : > { %v1641_v11 = vmax.f32 %v1599_v1, 0.0 }
 0x26a   : > { %v2439_v38 = vpack.c.bf16 %v1641_v11, %v1640_v34 }
 0x26c   : > { %2467 = vst [vmem:[%s3110_s25 + $0x60] sm:$0xff] %v2439_v38  }
 0x26d   : > { %v1601_v39 = vpop.f32.mrf.mxu0 }
 0x26e   : > { %v1602_v40 = vadd.f32 %v3103_v31, %v1601_v39 }
 0x270   : > { %v1642_v36 = vmax.f32 %v1602_v40, 0.0 }
 0x275   : > { %v1603_v41 = vpop.f32.mrf.mxu0 }
 0x276   : > { %v1604_v51 = vadd.f32 %v3103_v31, %v1603_v41 }
 0x278   : > { %v1643_v42 = vmax.f32 %v1604_v51, 0.0 }
 0x27a   : > { %v2444_v43 = vpack.c.bf16 %v1643_v42, %v1642_v36 }
 0x27c   : > { %2468 = vst [vmem:[%s3110_s25 + $0x68] sm:$0xff] %v2444_v43  }
 0x27d   : > { %v1606_v44 = vpop.f32.mrf.mxu0 }
 0x27e   : > { %v1607_v46 = vadd.f32 %v3103_v31, %v1606_v44 }
 0x280   : > { %v1644_v48 = vmax.f32 %v1607_v46, 0.0 }
 0x285   : > { %v1608_v61 = vpop.f32.mrf.mxu0 }
 0x286   : > { %v1609_v47 = vadd.f32 %v3103_v31, %v1608_v61 }
 0x288   : > { %v1645_v50 = vmax.f32 %v1609_v47, 0.0 }
 0x28a   : > { %v2449_v52 = vpack.c.bf16 %v1645_v50, %v1644_v48 }
 0x28c   : > { %2469 = vst [vmem:[%s3110_s25 + $0x70] sm:$0xff] %v2449_v52  }
 0x28d   : > { %v1611_v55 = vpop.f32.mrf.mxu0 }
 0x28e   : > { %v1612_v56 = vadd.f32 %v3103_v31, %v1611_v55 }
 0x290   : > { %v1646_v62 = vmax.f32 %v1612_v56, 0.0 }
 0x295   : > { %v1613_v57 = vpop.f32.mrf.mxu0 }
 0x296   : > { %v1614_v18 = vadd.f32 %v3103_v31, %v1613_v57 }
 0x298   : > { %v1647_v58 = vmax.f32 %v1614_v18, 0.0 }
 0x29a   : > { %v2454_v59 = vpack.c.bf16 %v1647_v58, %v1646_v62 }
 0x29c   : > { %2470 = vst [vmem:[%s3110_s25 + $0x78] sm:$0xff] %v2454_v59  }
 0x29d   : > { %2702 = shalt.err (!%p2699_p0)
}
 0x29e   : > { %s2769_s21 = smov 64   ;;  %s2770_s1 = smov 4  }
 0x29f   : > { %2505 = dma.vmem_to_hbm [thread:$0]  (%p2879_p7), %s1726_s9, 2048, %s1728_s10, %s1713_s11, %s2769_s21, %s2769_s21, %s2770_s1  }
 0x2a0 PF: > { %s1742_s2 = sand.u32 1, %s2741_s15   ;;  %p2519_p3 = pnand %p1838_p11, %p2845_p6 }
 0x2a1   : > { %s1743_s23 = scalar_lea.sflag [#allocation5], %s1742_s2 }
 0x2a2   : > { %p2520_p5 = pneg %p2519_p3 }
 0x2a4   : > { %2736 = dma.done.wait (%p2520_p5), %s1743_s23, 2048  }
 0x2a5   : > { %2738 = vsyncadd (%p2520_p5), %s1743_s23, 4294965248  ;;  %s21_s20 = sadd.s32 1, %s2761_s20   ;;  %s3225_s15 = smov %s2745_s16 }
 0x2a6   : > { %p18_p9 = scmp.ge.s32.totalorder %s21_s20, 4   ;;  %s3226_s16 = smov %s2749_s17 }
 0x2a7   : > { %s3227_s17 = smov %s2888_s7  ;;  %s3228_s18 = smov %s2757_s19 }
 0x2a8   : > { %s3229_s19 = smov %s3231_s14  ;;  %20 = sbr.rel (!%p18_p9) target bundleno = 10 (0xa), region = 98 }
 0x2ad   :  { %1749 = vsyncpa [#allocation4], 1 }
 0x2ae   :  { %1751 = vsyncpa [#allocation4 + $0x1], 1 }
 0x2af   :  { %1752 = vsyncpa [#allocation7], 1 }
 0x2b0   :  { %1753 = vsyncpa [#allocation5], 1 }
 0x2b1   :  { %1755 = vsyncpa [#allocation5 + $0x1], 1 }

</bundles_post_ra>
